<compile_context>
chip_gen: v7x
topology: tpu7x:2x2x1
jax: 0.10.0
libtpu: 0.0.40
codegen_flags: <defaults>
</compile_context>

<pallas_src>
import functools
import math

import jax
import jax.numpy as jnp
from jax import lax
from jax.experimental import pallas as pl
from jax.experimental.pallas import tpu as pltpu

LANE = 128


def _round_up(x, m):
    return pl.cdiv(x, m) * m


def _apply_act_f32(y, act):
    """Activation in f32 (used both in-kernel and in the pure-JAX reference)."""
    if act == "relu":
        return jnp.maximum(y, 0.0)
    if act == "leakyrelu":
        return jnp.where(y > 0, y, 0.1 * y)          # module spec: slope=0.1
    if act == "selu":
        alpha = 1.6732632423543772
        scale = 1.0507009873554805
        return scale * jnp.where(y > 0, y, alpha * (jnp.exp(y) - 1.0))
    return y                                          # falsy -> identity


# ----------------------------- Pallas kernels ------------------------------ #

def _conv_gemm_kernel_1pass(p_ref, w_ref, shift_ref, o_ref, *, act):
    """Single K tile: out = act(patches @ weight + shift)."""
    y = jnp.dot(p_ref[...], w_ref[...], preferred_element_type=jnp.float32)
    y = _apply_act_f32(y + shift_ref[...], act)
    o_ref[...] = y.astype(o_ref.dtype)


def _conv_gemm_kernel_kacc(p_ref, w_ref, shift_ref, o_ref, acc_ref, *, act):
    """K-tiled: acc += patch_tile @ weight_tile; last K step adds shift + act."""
    k = pl.program_id(1)

    @pl.when(k == 0)
    def _():
        acc_ref[...] = jnp.zeros_like(acc_ref)

    acc_ref[...] += jnp.dot(p_ref[...], w_ref[...],
                            preferred_element_type=jnp.float32)

    @pl.when(k == pl.num_programs(1) - 1)
    def _():
        y = _apply_act_f32(acc_ref[...] + shift_ref[...], act)
        o_ref[...] = y.astype(o_ref.dtype)


def fused_matmul_shift_act(patches, weight, shift, act, out_dtype,
                           *, tm=512, tk_max=1024):
    """patches: (M, Kp) bf16, weight: (Kp, Np) bf16 (scale folded in),
    shift: (1, Np) f32.  Kp, Np are multiples of 128.  Returns (M, Np)."""
    M, Kp = patches.shape
    _, Np = weight.shape

    tm = min(tm, _round_up(M, 16))
    m_pad = _round_up(M, tm)
    if m_pad != M:
        # TODO(synk): handle the ragged M tail with an in-kernel masked store
        # instead of an HBM pad of the patch matrix.
        patches = jnp.pad(patches, ((0, m_pad - M), (0, 0)))

    if Kp <= tk_max:
        # Whole contraction in one tile: no accumulator scratch, 1-D grid.
        out = pl.pallas_call(
            functools.partial(_conv_gemm_kernel_1pass, act=act),
            out_shape=jax.ShapeDtypeStruct((m_pad, Np), out_dtype),
            grid_spec=pltpu.PrefetchScalarGridSpec(
                num_scalar_prefetch=0,
                grid=(m_pad // tm,),
                in_specs=[
                    pl.BlockSpec((tm, Kp), lambda i: (i, 0)),   # patch tile
                    pl.BlockSpec((Kp, Np), lambda i: (0, 0)),   # resident weight
                    pl.BlockSpec((1, Np), lambda i: (0, 0)),    # resident shift
                ],
                out_specs=pl.BlockSpec((tm, Np), lambda i: (i, 0)),
            ),
            compiler_params=pltpu.CompilerParams(
                dimension_semantics=("parallel",)),
        )(patches, weight, shift)
    else:
        # Largest 128-multiple K tile that divides Kp (Kp is a 128 multiple).
        tk = tk_max
        while Kp % tk:
            tk -= LANE
        out = pl.pallas_call(
            functools.partial(_conv_gemm_kernel_kacc, act=act),
            out_shape=jax.ShapeDtypeStruct((m_pad, Np), out_dtype),
            grid_spec=pltpu.PrefetchScalarGridSpec(
                num_scalar_prefetch=0,
                grid=(m_pad // tm, Kp // tk),
                in_specs=[
                    pl.BlockSpec((tm, tk), lambda i, k: (i, k)),
                    pl.BlockSpec((tk, Np), lambda i, k: (k, 0)),
                    pl.BlockSpec((1, Np), lambda i, k: (0, 0)),
                ],
                out_specs=pl.BlockSpec((tm, Np), lambda i, k: (i, 0)),
                scratch_shapes=[pltpu.VMEM((tm, Np), jnp.float32)],
            ),
            compiler_params=pltpu.CompilerParams(
                dimension_semantics=("parallel", "arbitrary")),
        )(patches, weight, shift)
    return out[:M]


# ------------------------------- JAX glue ---------------------------------- #

def im2col3d_nhwc(x, ksize, stride, pad, k_pad):
    """x: (N, D, H, W, C) -> ((N*Do*Ho*Wo, k_pad), (Do, Ho, Wo)).

    K order is (kd, kh, kw, c); zero columns pad K up to k_pad so no separate
    pad pass over the expanded patch matrix is needed."""
    n, d, h, w, c = x.shape
    k = ksize
    xp = jnp.pad(x, ((0, 0), (pad, pad), (pad, pad), (pad, pad), (0, 0)))
    do = (d + 2 * pad - k) // stride + 1
    ho = (h + 2 * pad - k) // stride + 1
    wo = (w + 2 * pad - k) // stride + 1
    pieces = []
    for kd in range(k):
        for kh in range(k):
            for kw in range(k):
                pieces.append(
                    xp[:,
                       kd:kd + do * stride:stride,
                       kh:kh + ho * stride:stride,
                       kw:kw + wo * stride:stride, :])
    extra = k_pad - c * k ** 3
    if extra:
        pieces.append(jnp.zeros((n, do, ho, wo, extra), x.dtype))
    p = jnp.concatenate(pieces, axis=-1).reshape(n * do * ho * wo, k_pad)
    return p, (do, ho, wo)


def conv3d_bn_act_layer(x, lp, ksize, stride, pad, act, out_dtype):
    """x: (N, D, H, W, Cin) bf16 channels-last -> (N, Do, Ho, Wo, Cout)."""
    n, _, _, _, cin = x.shape
    weight, bias = lp["weight"], lp["bias"]          # (Cout, Cin, k, k, k), (Cout,)
    cout = weight.shape[0]
    K = cin * ksize ** 3
    k_pad = _round_up(K, LANE)
    n_pad = _round_up(cout, LANE)

    # Fold conv bias + (eval-mode running-stats) BatchNorm into (scale, shift).
    if lp["bn"] is not None:
        gamma, beta, mean, var, eps = lp["bn"]
        s = gamma / jnp.sqrt(var + eps)
        scale, shift = s, (bias - mean) * s + beta
    else:
        scale, shift = jnp.ones((cout,), jnp.float32), bias

    # (Cout, Cin, kd, kh, kw) -> (kd, kh, kw, Cin, Cout) -> (K, Cout); fold the
    # scale into the weight; zero-pad K and Cout (exact for the matmul; padded
    # output columns are sliced off below).
    w2 = weight.transpose(2, 3, 4, 1, 0).reshape(K, cout) * scale[None, :]
    w2 = jnp.pad(w2, ((0, k_pad - K), (0, n_pad - cout))).astype(jnp.bfloat16)
    shift2 = jnp.pad(shift.astype(jnp.float32),
                     (0, n_pad - cout)).reshape(1, n_pad)

    # bf16 patches: halves HBM traffic of the dominant (k^3-expanded) tensor
    # and feeds the MXU natively; accumulation stays f32 in the kernel.
    patches, (do, ho, wo) = im2col3d_nhwc(x, ksize, stride, pad, k_pad)

    out = fused_matmul_shift_act(patches, w2, shift2, act, out_dtype)
    return out[:, :cout].reshape(n, do, ho, wo, cout)


def cnn_layers_forward(x, params, kernel_size, strides, paddings, activations):
    # Dropout3d with p=0.0 is never added by the PyTorch module (`if dropout:`);
    # nonzero dropout would be identity in eval mode anyway.
    x = x.transpose(0, 2, 3, 4, 1).astype(jnp.bfloat16)    # NCDHW -> NDHWC once
    n_layers = len(params)
    for idx, lp in enumerate(params):
        out_dtype = jnp.float32 if idx == n_layers - 1 else jnp.bfloat16
        x = conv3d_bn_act_layer(x, lp, kernel_size[idx], strides[idx],
                                paddings[idx], activations[idx], out_dtype)
    return x.transpose(0, 4, 1, 2, 3)                       # NDHWC -> NCDHW once


# --------------------------- reference (pure JAX) --------------------------- #

def cnn_layers_reference(x, params, kernel_size, strides, paddings, activations):
    for idx, lp in enumerate(params):
        k, s, pad = kernel_size[idx], strides[idx], paddings[idx]
        y = lax.conv_general_dilated(
            x, lp["weight"], window_strides=(s, s, s),
            padding=[(pad, pad)] * 3,
            dimension_numbers=("NCDHW", "OIDHW", "NCDHW"))
        y = y + lp["bias"].reshape(1, -1, 1, 1, 1)
        if lp["bn"] is not None:
            gamma, beta, mean, var, eps = lp["bn"]
            rs = lambda v: v.reshape(1, -1, 1, 1, 1)
            y = (y - rs(mean)) / jnp.sqrt(rs(var) + eps) * rs(gamma) + rs(beta)
        x = _apply_act_f32(y, activations[idx])
    return x


# ------------------------------ param init --------------------------------- #

def init_params(key, in_dim, n_f, kernel_size, bns):
    params = []
    cin = in_dim
    for idx, cout in enumerate(n_f):
        key, k1, k2, k3, k4, k5, k6 = jax.random.split(key, 7)
        k = kernel_size[idx]
        bound = 1.0 / math.sqrt(cin * k ** 3)
        layer = {
            "weight": jax.random.uniform(k1, (cout, cin, k, k, k),
                                         jnp.float32, -bound, bound),
            "bias": jax.random.uniform(k2, (cout,), jnp.float32, -bound, bound),
            "bn": None,
        }
        if bns[idx]:
            layer["bn"] = (
                jax.random.uniform(k3, (cout,), jnp.float32, 0.5, 1.5),   # gamma
                jax.random.uniform(k4, (cout,), jnp.float32, -0.5, 0.5),  # beta
                jax.random.normal(k5, (cout,), jnp.float32) * 0.1,        # run mean
                jax.random.uniform(k6, (cout,), jnp.float32, 0.5, 1.5),   # run var
                1e-5,
            )
        params.append(layer)
        cin = cout
    return params


# ---------------------------------- main ------------------------------------ #

if __name__ == "__main__":
    # args implied by the module
    in_dim = 4
    n_f = [8, 16]
    kernel_size = [3, 3]
    strides = [1, 1]
    paddings = [1, 1]
    bns = [True, False]
    dropouts = [0.0, 0.0]            # falsy -> no Dropout3d layer added
    activations = ["relu", "leakyrelu"]

    key = jax.random.PRNGKey(0)
    kx, kp = jax.random.split(key)
    x = jax.random.normal(kx, (2, in_dim, 8, 8, 8), jnp.float32)   # NCDHW
    params = init_params(kp, in_dim, n_f, kernel_size, bns)

    fwd = jax.jit(lambda xx, pp: cnn_layers_forward(
        xx, pp, kernel_size, strides, paddings, activations))
    out = jax.block_until_ready(fwd(x, params))

    ref = cnn_layers_reference(x, params, kernel_size, strides, paddings,
                               activations)
    assert out.shape == ref.shape == (2, n_f[-1], 8, 8, 8), (out.shape, ref.shape)
    # bf16 MXU operands / bf16 inter-layer activations with f32 accumulation.
    assert jnp.allclose(out, ref, atol=3e-2, rtol=3e-2), \
        float(jnp.max(jnp.abs(out - ref)))
    print("KERNEL_OK")
</pallas_src>

<mosaic_0001>
module attributes {stable_mosaic.version = 11 : i64} {
  func.func @_conv_gemm_kernel_1pass(%arg0: i32, %arg1: memref<512x128xbf16, #tpu.memory_space<vmem>>, %arg2: memref<128x128xbf16, #tpu.memory_space<vmem>>, %arg3: memref<1x128xf32, #tpu.memory_space<vmem>>, %arg4: memref<512x128xbf16, #tpu.memory_space<vmem>>) attributes {dimension_semantics = [#tpu.dimension_semantics<parallel>], iteration_bounds = array<i64: 2>, scalar_prefetch = 0 : i64, scratch_operands = 0 : i64, tpu.core_type = #tpu.core_type<tc>, window_params = [{transform_indices = @transform_0, window_bounds = array<i64: 512, 128>}, {pipeline_mode = #tpu.pipeline_mode<synchronous>, transform_indices = @transform_1, window_bounds = array<i64: 128, 128>}, {pipeline_mode = #tpu.pipeline_mode<synchronous>, transform_indices = @transform_2, window_bounds = array<i64: 1, 128>}, {transform_indices = @transform_3, window_bounds = array<i64: 512, 128>}]} {
    %c0 = arith.constant 0 : index
    %c0_0 = arith.constant 0 : index
    %0 = vector.load %arg1[%c0, %c0_0] : memref<512x128xbf16, #tpu.memory_space<vmem>>, vector<512x128xbf16>
    %c0_1 = arith.constant 0 : index
    %c0_2 = arith.constant 0 : index
    %1 = vector.load %arg2[%c0_1, %c0_2] : memref<128x128xbf16, #tpu.memory_space<vmem>>, vector<128x128xbf16>
    %cst = arith.constant dense<0.000000e+00> : vector<512x128xf32>
    %2 = tpu.matmul %0, %1, %cst {dimension_numbers = #tpu.dot_dimension_numbers<[1], [0], [0], [1], [0, 0, 1, 1], [], []>} : vector<512x128xbf16>, vector<128x128xbf16>, vector<512x128xf32> -> vector<512x128xf32>
    %c0_3 = arith.constant 0 : index
    %c0_4 = arith.constant 0 : index
    %3 = vector.load %arg3[%c0_3, %c0_4] : memref<1x128xf32, #tpu.memory_space<vmem>>, vector<1x128xf32>
    %4 = vector.broadcast %3 : vector<1x128xf32> to vector<512x128xf32>
    %5 = arith.addf %2, %4 : vector<512x128xf32>
    %cst_5 = arith.constant 0.000000e+00 : f32
    %6 = vector.broadcast %cst_5 : f32 to vector<512x128xf32>
    %7 = arith.maximumf %5, %6 : vector<512x128xf32>
    %8 = arith.truncf %7 : vector<512x128xf32> to vector<512x128xbf16>
    %c0_6 = arith.constant 0 : index
    %c0_7 = arith.constant 0 : index
    %9 = vector.load %arg4[%c0_6, %c0_7] : memref<512x128xbf16, #tpu.memory_space<vmem>>, vector<512x128xbf16>
    tpu.vector_store %arg4[%c0_6, %c0_7], %8 {strides = array<i32>} : memref<512x128xbf16, #tpu.memory_space<vmem>>, vector<512x128xbf16>,
    return
  }
  func.func @transform_0(%arg0: i32) -> (i32, i32) {
    %c0_i32 = arith.constant 0 : i32
    %c0_i32_0 = arith.constant 0 : i32
    return %arg0, %c0_i32 : i32, i32
  }
  func.func @transform_1(%arg0: i32) -> (i32, i32) {
    %c0_i32 = arith.constant 0 : i32
    %c0_i32_0 = arith.constant 0 : i32
    %c0_i32_1 = arith.constant 0 : i32
    return %c0_i32, %c0_i32_0 : i32, i32
  }
  func.func @transform_2(%arg0: i32) -> (i32, i32) {
    %c0_i32 = arith.constant 0 : i32
    %c0_i32_0 = arith.constant 0 : i32
    %c0_i32_1 = arith.constant 0 : i32
    return %c0_i32, %c0_i32_0 : i32, i32
  }
  func.func @transform_3(%arg0: i32) -> (i32, i32) {
    %c0_i32 = arith.constant 0 : i32
    %c0_i32_0 = arith.constant 0 : i32
    return %arg0, %c0_i32 : i32, i32
  }
}

module attributes {stable_mosaic.version = 11 : i64} {
  func.func @_conv_gemm_kernel_1pass(%arg0: i32, %arg1: memref<512x256xbf16, #tpu.memory_space<vmem>>, %arg2: memref<256x128xbf16, #tpu.memory_space<vmem>>, %arg3: memref<1x128xf32, #tpu.memory_space<vmem>>, %arg4: memref<512x128xf32, #tpu.memory_space<vmem>>) attributes {dimension_semantics = [#tpu.dimension_semantics<parallel>], iteration_bounds = array<i64: 2>, scalar_prefetch = 0 : i64, scratch_operands = 0 : i64, tpu.core_type = #tpu.core_type<tc>, window_params = [{transform_indices = @transform_0, window_bounds = array<i64: 512, 256>}, {pipeline_mode = #tpu.pipeline_mode<synchronous>, transform_indices = @transform_1, window_bounds = array<i64: 256, 128>}, {pipeline_mode = #tpu.pipeline_mode<synchronous>, transform_indices = @transform_2, window_bounds = array<i64: 1, 128>}, {transform_indices = @transform_3, window_bounds = array<i64: 512, 128>}]} {
    %c0 = arith.constant 0 : index
    %c0_0 = arith.constant 0 : index
    %0 = vector.load %arg1[%c0, %c0_0] : memref<512x256xbf16, #tpu.memory_space<vmem>>, vector<512x256xbf16>
    %c0_1 = arith.constant 0 : index
    %c0_2 = arith.constant 0 : index
    %1 = vector.load %arg2[%c0_1, %c0_2] : memref<256x128xbf16, #tpu.memory_space<vmem>>, vector<256x128xbf16>
    %cst = arith.constant dense<0.000000e+00> : vector<512x128xf32>
    %2 = tpu.matmul %0, %1, %cst {dimension_numbers = #tpu.dot_dimension_numbers<[1], [0], [0], [1], [0, 0, 1, 1], [], []>} : vector<512x256xbf16>, vector<256x128xbf16>, vector<512x128xf32> -> vector<512x128xf32>
    %c0_3 = arith.constant 0 : index
    %c0_4 = arith.constant 0 : index
    %3 = vector.load %arg3[%c0_3, %c0_4] : memref<1x128xf32, #tpu.memory_space<vmem>>, vector<1x128xf32>
    %4 = vector.broadcast %3 : vector<1x128xf32> to vector<512x128xf32>
    %5 = arith.addf %2, %4 : vector<512x128xf32>
    %cst_5 = arith.constant 0.000000e+00 : f32
    %6 = vector.broadcast %cst_5 : f32 to vector<512x128xf32>
    %7 = arith.cmpf ogt, %5, %6 : vector<512x128xf32>
    %cst_6 = arith.constant 1.000000e-01 : f32
    %8 = vector.broadcast %cst_6 : f32 to vector<512x128xf32>
    %9 = arith.mulf %8, %5 : vector<512x128xf32>
    %10 = arith.select %7, %5, %9 : vector<512x128xi1>, vector<512x128xf32>
    %c0_7 = arith.constant 0 : index
    %c0_8 = arith.constant 0 : index
    %11 = vector.load %arg4[%c0_7, %c0_8] : memref<512x128xf32, #tpu.memory_space<vmem>>, vector<512x128xf32>
    tpu.vector_store %arg4[%c0_7, %c0_8], %10 {strides = array<i32>} : memref<512x128xf32, #tpu.memory_space<vmem>>, vector<512x128xf32>,
    return
  }
  func.func @transform_0(%arg0: i32) -> (i32, i32) {
    %c0_i32 = arith.constant 0 : i32
    %c0_i32_0 = arith.constant 0 : i32
    return %arg0, %c0_i32 : i32, i32
  }
  func.func @transform_1(%arg0: i32) -> (i32, i32) {
    %c0_i32 = arith.constant 0 : i32
    %c0_i32_0 = arith.constant 0 : i32
    %c0_i32_1 = arith.constant 0 : i32
    return %c0_i32, %c0_i32_0 : i32, i32
  }
  func.func @transform_2(%arg0: i32) -> (i32, i32) {
    %c0_i32 = arith.constant 0 : i32
    %c0_i32_0 = arith.constant 0 : i32
    %c0_i32_1 = arith.constant 0 : i32
    return %c0_i32, %c0_i32_0 : i32, i32
  }
  func.func @transform_3(%arg0: i32) -> (i32, i32) {
    %c0_i32 = arith.constant 0 : i32
    %c0_i32_0 = arith.constant 0 : i32
    return %arg0, %c0_i32 : i32, i32
  }
}

</mosaic_0001>

<bundles_post_ra>
// kernel: _lambda_.2
= control target key start
LH: loop header
LB: loop body
LE: loop exit
PB: predicated region body
PF: predicated region fallthrough
CT: control target
= control target key end

     0   :  { %s1814_s12 = smov 0   ;;  %s1999_s0 = inlined_call_operand.vmem [shape: bf16[1024,128], index: 0, kind: input, shape index: {}]   ;;  %s2000_s1 = inlined_call_operand.vmem [shape: bf16[128,128], index: 1, kind: input, shape index: {}]   ;;  %s2001_s2 = inlined_call_operand.vmem [shape: f32[1,128], index: 2, kind: input, shape index: {}]   ;;  %s2002_s3 = inlined_call_operand.vmem [shape: bf16[1024,128], index: 3, kind: output, shape index: {}]  }
   0x1 LB: > { %s1231_s13 = sadd.s32 4294967295, %s1792_s12   ;;  %p1235_p0 = scmp.ge.s32.totalorder %s1792_s12, 1  ;;  %s1792_s12 = sphi %s1814_s12, %s13_s12  }
   0x2   : > { %p138_p1 = scmp.lt.s32.totalorder %s1792_s12, 3 }
   0x4   : > { %p139_p2 = pnand %p1235_p0, %p138_p1 }
   0x5   : > { %v1746_v0 = vld [vmem:[%s2000_s1] sm:$0xff] (!%p139_p2)   ;;  %s1236_s16 = sshll.u32 (!%p139_p2), %s1231_s13, 6  ;;  %v1747_v1 = vld [vmem:[%s2000_s1 + $0x8] sm:$0xff] (!%p139_p2)   ;;  %v1748_v2 = vld [vmem:[%s2000_s1 + $0x10] sm:$0xff] (!%p139_p2)  }
   0x6   : > { %142 = sbr.rel (%p139_p2) target bundleno = 316 (0x13c), region = 32  ;;  %p163_p3 = scmp.lt.s32.totalorder (!%p139_p2), %s1236_s16, 127  ;;  %1642 = vmatprep.subr.bf16.mxu0 (!%p139_p2), %v1746_v0  ;;  %1722 = vmatprep.subr.bf16.mxu1 (!%p139_p2), %v1746_v0  ;;  %v1749_v3 = vld [vmem:[%s2000_s1 + $0x18] sm:$0xff] (!%p139_p2)   ;;  %v1750_v6 = vld [vmem:[%s2000_s1 + $0x20] sm:$0xff] (!%p139_p2)   ;;  %v1751_v7 = vld [vmem:[%s2000_s1 + $0x28] sm:$0xff] (!%p139_p2)  }
   0x7   : > { %1643 = vmatpush3.bf16.msra.mxu0 (!%p139_p2), %v1746_v0  ;;  %1730 = vmatpush3.bf16.msra.mxu1 (!%p139_p2), %v1746_v0  ;;  %v1752_v8 = vld [vmem:[%s2000_s1 + $0x30] sm:$0xff] (!%p139_p2)   ;;  %v1753_v9 = vld [vmem:[%s2000_s1 + $0x38] sm:$0xff] (!%p139_p2)   ;;  %v1891_v40 = vld [vmem:[%s2001_s2] ss:$0 sm:$0xff] (!%p139_p2) }
   0x8   : > { %1644 = vmatprep.subr.bf16.mxu0 (!%p139_p2), %v1747_v1  ;;  %1723 = vmatprep.subr.bf16.mxu1 (!%p139_p2), %v1747_v1 }
   0xb   : > { %1645 = vmatpush3.bf16.msra.mxu0 (!%p139_p2), %v1747_v1  ;;  %1731 = vmatpush3.bf16.msra.mxu1 (!%p139_p2), %v1747_v1 }
   0xc   : > { %1646 = vmatprep.subr.bf16.mxu0 (!%p139_p2), %v1748_v2  ;;  %1724 = vmatprep.subr.bf16.mxu1 (!%p139_p2), %v1748_v2 }
   0xd   : > { %s2004_s16 = smov (!%p163_p3, %s1236_s16), 127 }
   0xe   : > { %s1237_s21 = sshll.u32 %s2004_s16, 2 }
   0xf   : > { %s1839_s24 = scalar_lea.vmem %s1999_s0, %s1237_s21  ;;  %1647 = vmatpush3.bf16.msra.mxu0 %v1748_v2  ;;  %1732 = vmatpush3.bf16.msra.mxu1 %v1748_v2  ;;  %s1906_s13 = scalar_lea.vmem %s2002_s3, %s1237_s21 }
  0x10   : > { %v1754_v4 = vld [vmem:[%s1839_s24] sm:$0xff]   ;;  %1648 = vmatprep.subr.bf16.mxu0 %v1749_v3  ;;  %1725 = vmatprep.subr.bf16.mxu1 %v1749_v3  ;;  %v1756_v10 = vld [vmem:[%s1839_s24 + $0x8] sm:$0xff]   ;;  %v1758_v12 = vld [vmem:[%s1839_s24 + $0x10] sm:$0xff]  }
  0x11   : > { %v1755_v5 = vld [vmem:[%s1839_s24 + $0x80] sm:$0xff]   ;;  %1658 = vmatprep.mubr.bf16.mxu0 %v1754_v4  ;;  %v1757_v11 = vld [vmem:[%s1839_s24 + $0x88] sm:$0xff]   ;;  %v1759_v13 = vld [vmem:[%s1839_s24 + $0x90] sm:$0xff]  }
  0x12   : > { %1690 = vmatprep.mubr.bf16.mxu1 %v1755_v5  ;;  %v1760_v14 = vld [vmem:[%s1839_s24 + $0x18] sm:$0xff]   ;;  %v1762_v16 = vld [vmem:[%s1839_s24 + $0x20] sm:$0xff]   ;;  %v1764_v18 = vld [vmem:[%s1839_s24 + $0x28] sm:$0xff]  }
  0x13   : > { %1649 = vmatpush3.bf16.msra.mxu0 %v1749_v3  ;;  %1733 = vmatpush3.bf16.msra.mxu1 %v1749_v3  ;;  %v1761_v15 = vld [vmem:[%s1839_s24 + $0x98] sm:$0xff]   ;;  %v1763_v17 = vld [vmem:[%s1839_s24 + $0xa0] sm:$0xff]   ;;  %v1765_v19 = vld [vmem:[%s1839_s24 + $0xa8] sm:$0xff]  }
  0x14   : > { %1650 = vmatprep.subr.bf16.mxu0 %v1750_v6  ;;  %1726 = vmatprep.subr.bf16.mxu1 %v1750_v6  ;;  %v1766_v20 = vld [vmem:[%s1839_s24 + $0x30] sm:$0xff]   ;;  %v1768_v22 = vld [vmem:[%s1839_s24 + $0x38] sm:$0xff]   ;;  %v1770_v24 = vld [vmem:[%s1839_s24 + $0x40] sm:$0xff]  }
  0x15   : > { %v1767_v21 = vld [vmem:[%s1839_s24 + $0xb0] sm:$0xff]   ;;  %v1769_v23 = vld [vmem:[%s1839_s24 + $0xb8] sm:$0xff]   ;;  %v1771_v25 = vld [vmem:[%s1839_s24 + $0xc0] sm:$0xff]  }
  0x16   : > { %v1772_v26 = vld [vmem:[%s1839_s24 + $0x48] sm:$0xff]   ;;  %v1774_v28 = vld [vmem:[%s1839_s24 + $0x50] sm:$0xff]   ;;  %v1776_v30 = vld [vmem:[%s1839_s24 + $0x58] sm:$0xff]  }
  0x17   : > { %1651 = vmatpush3.bf16.msra.mxu0 %v1750_v6  ;;  %1734 = vmatpush3.bf16.msra.mxu1 %v1750_v6  ;;  %v1773_v27 = vld [vmem:[%s1839_s24 + $0xc8] sm:$0xff]   ;;  %v1775_v29 = vld [vmem:[%s1839_s24 + $0xd0] sm:$0xff]   ;;  %v1777_v31 = vld [vmem:[%s1839_s24 + $0xd8] sm:$0xff]  }
  0x18   : > { %1652 = vmatprep.subr.bf16.mxu0 %v1751_v7  ;;  %1727 = vmatprep.subr.bf16.mxu1 %v1751_v7  ;;  %v1778_v32 = vld [vmem:[%s1839_s24 + $0x60] sm:$0xff]   ;;  %v1780_v34 = vld [vmem:[%s1839_s24 + $0x68] sm:$0xff]   ;;  %v1782_v36 = vld [vmem:[%s1839_s24 + $0x70] sm:$0xff]  }
  0x19   : > { %v1779_v33 = vld [vmem:[%s1839_s24 + $0xe0] sm:$0xff]   ;;  %v1781_v35 = vld [vmem:[%s1839_s24 + $0xe8] sm:$0xff]   ;;  %v1783_v37 = vld [vmem:[%s1839_s24 + $0xf0] sm:$0xff]  }
  0x1a   : > { %v1784_v38 = vld [vmem:[%s1839_s24 + $0x78] sm:$0xff]  }
  0x1b   : > { %1653 = vmatpush3.bf16.msra.mxu0 %v1751_v7  ;;  %1735 = vmatpush3.bf16.msra.mxu1 %v1751_v7  ;;  %v1785_v39 = vld [vmem:[%s1839_s24 + $0xf8] sm:$0xff]  }
  0x1c   : > { %1654 = vmatprep.subr.bf16.mxu0 %v1752_v8  ;;  %1728 = vmatprep.subr.bf16.mxu1 %v1752_v8 }
  0x1f   : > { %1655 = vmatpush3.bf16.msra.mxu0 %v1752_v8  ;;  %1736 = vmatpush3.bf16.msra.mxu1 %v1752_v8 }
  0x20   : > { %1656 = vmatprep.subr.bf16.mxu0 %v1753_v9  ;;  %1729 = vmatprep.subr.bf16.mxu1 %v1753_v9 }
  0x23   : > { %1657 = vmatpush3.bf16.msra.mxu0 %v1753_v9  ;;  %1737 = vmatpush3.bf16.msra.mxu1 %v1753_v9 }
  0x26   : > { %1659 = vmatmul.mubr.bf16.vlgmr.msra.gmra.mrb[0].mxu0 %v1756_v10  ;;  %1691 = vmatmul.mubr.bf16.vlgmr.msra.gmra.mrb[0].mxu1 %v1757_v11 }
  0x27   : > { %1662 = vmatprep.mubr.bf16.mxu0 %v1758_v12  ;;  %1694 = vmatprep.mubr.bf16.mxu1 %v1759_v13 }
  0x2e   : > { %1663 = vmatmul.mubr.bf16.gmra.mrb[4].mxu0 %v1760_v14  ;;  %1695 = vmatmul.mubr.bf16.gmra.mrb[4].mxu1 %v1761_v15 }
  0x2f   : > { %1666 = vmatprep.mubr.bf16.mxu0 %v1762_v16  ;;  %1698 = vmatprep.mubr.bf16.mxu1 %v1763_v17 }
  0x36   : > { %1667 = vmatmul.mubr.bf16.gmra.mrb[8].mxu0 %v1764_v18  ;;  %1699 = vmatmul.mubr.bf16.gmra.mrb[8].mxu1 %v1765_v19 }
  0x37   : > { %1670 = vmatprep.mubr.bf16.mxu0 %v1766_v20  ;;  %1702 = vmatprep.mubr.bf16.mxu1 %v1767_v21 }
  0x3e   : > { %1671 = vmatmul.mubr.bf16.gmra.mrb[12].mxu0 %v1768_v22  ;;  %1703 = vmatmul.mubr.bf16.gmra.mrb[12].mxu1 %v1769_v23 }
  0x3f   : > { %1674 = vmatprep.mubr.bf16.mxu0 %v1770_v24  ;;  %1706 = vmatprep.mubr.bf16.mxu1 %v1771_v25 }
  0x46   : > { %1675 = vmatmul.mubr.bf16.gmra.mrb[16].mxu0 %v1772_v26  ;;  %1707 = vmatmul.mubr.bf16.gmra.mrb[16].mxu1 %v1773_v27 }
  0x47   : > { %1678 = vmatprep.mubr.bf16.mxu0 %v1774_v28  ;;  %1710 = vmatprep.mubr.bf16.mxu1 %v1775_v29 }
  0x4e   : > { %1679 = vmatmul.mubr.bf16.gmra.mrb[20].mxu0 %v1776_v30  ;;  %1711 = vmatmul.mubr.bf16.gmra.mrb[20].mxu1 %v1777_v31 }
  0x4f   : > { %1682 = vmatprep.mubr.bf16.mxu0 %v1778_v32  ;;  %1714 = vmatprep.mubr.bf16.mxu1 %v1779_v33 }
  0x56   : > { %1683 = vmatmul.mubr.bf16.gmra.mrb[24].mxu0 %v1780_v34  ;;  %1715 = vmatmul.mubr.bf16.gmra.mrb[24].mxu1 %v1781_v35 }
  0x57   : > { %1686 = vmatprep.mubr.bf16.mxu0 %v1782_v36  ;;  %1718 = vmatprep.mubr.bf16.mxu1 %v1783_v37 }
  0x5e   : > { %1687 = vmatmul.mubr.bf16.gmra.mrb[28].mxu0 %v1784_v38  ;;  %1719 = vmatmul.mubr.bf16.gmra.mrb[28].mxu1 %v1785_v39 }
  0xf9   : > { %v1660_v41 = vpop.f32.mrb[0].mxu0  ;;  %v1692_v42 = vpop.f32.mrb[0].mxu1 }
  0xfa   : > { %v545_v43 = vadd.f32 %v1660_v41, %v1891_v40  ;;  %v673_v44 = vadd.f32 %v1692_v42, %v1891_v40  ;;  %v536_v45 = vpop.f32.mrb[1].mxu0  ;;  %v664_v46 = vpop.f32.mrb[1].mxu1 }
  0xfb   : > { %v537_v47 = vadd.f32 %v1891_v40, %v536_v45  ;;  %v665_v48 = vadd.f32 %v1891_v40, %v664_v46  ;;  %v1661_v49 = vpop.f32.mrb[2].mxu0  ;;  %v1693_v50 = vpop.f32.mrb[2].mxu1 }
  0xfc   : > { %v548_v51 = vadd.f32 %v1661_v49, %v1891_v40  ;;  %v676_v52 = vadd.f32 %v1693_v50, %v1891_v40  ;;  %v539_v53 = vpop.f32.mrb[3].mxu0  ;;  %v667_v54 = vpop.f32.mrb[3].mxu1  ;;  %v793_v57 = vmax.f32 %v545_v43, 0.0  ;;  %v825_v58 = vmax.f32 %v673_v44, 0.0 }
  0xfd   : > { %v540_v55 = vadd.f32 %v1891_v40, %v539_v53  ;;  %v668_v56 = vadd.f32 %v1891_v40, %v667_v54  ;;  %v791_v61 = vmax.f32 %v537_v47, 0.0  ;;  %v823_v62 = vmax.f32 %v665_v48, 0.0 }
  0xfe   : > { %v794_v59 = vmax.f32 %v548_v51, 0.0  ;;  %v826_v60 = vmax.f32 %v676_v52, 0.0 }
  0xff   : > { %v792_v63 = vmax.f32 %v540_v55, 0.0  ;;  %v824_v0 = vmax.f32 %v668_v56, 0.0 }
 0x100   : > { %v1419_v1 = vpack.c.bf16 %v794_v59, %v793_v57  ;;  %v1499_v2 = vpack.c.bf16 %v826_v60, %v825_v58 }
 0x101   : > { %v1414_v3 = vpack.c.bf16 %v792_v63, %v791_v61  ;;  %v1494_v4 = vpack.c.bf16 %v824_v0, %v823_v62  ;;  %v1664_v5 = vpop.f32.mrb[4].mxu0  ;;  %v1696_v6 = vpop.f32.mrb[4].mxu1 }
 0x102   : > { %1571 = vst [vmem:[%s1906_s13 + $0x8] sm:$0xff] %v1419_v1   ;;  %1587 = vst [vmem:[%s1906_s13 + $0x88] sm:$0xff] %v1499_v2   ;;  %v561_v7 = vadd.f32 %v1664_v5, %v1891_v40  ;;  %v689_v8 = vadd.f32 %v1696_v6, %v1891_v40  ;;  %v552_v9 = vpop.f32.mrb[5].mxu0  ;;  %v680_v10 = vpop.f32.mrb[5].mxu1 }
 0x103   : > { %1415 = vst [vmem:[%s1906_s13] sm:$0xff] %v1414_v3   ;;  %1586 = vst [vmem:[%s1906_s13 + $0x80] sm:$0xff] %v1494_v4   ;;  %v553_v11 = vadd.f32 %v1891_v40, %v552_v9  ;;  %v681_v12 = vadd.f32 %v1891_v40, %v680_v10  ;;  %v1665_v13 = vpop.f32.mrb[6].mxu0  ;;  %v1697_v14 = vpop.f32.mrb[6].mxu1 }
 0x104   : > { %v564_v15 = vadd.f32 %v1665_v13, %v1891_v40  ;;  %v692_v16 = vadd.f32 %v1697_v14, %v1891_v40  ;;  %v555_v17 = vpop.f32.mrb[7].mxu0  ;;  %v683_v18 = vpop.f32.mrb[7].mxu1  ;;  %v797_v21 = vmax.f32 %v561_v7, 0.0  ;;  %v829_v22 = vmax.f32 %v689_v8, 0.0 }
 0x105   : > { %v556_v19 = vadd.f32 %v1891_v40, %v555_v17  ;;  %v684_v20 = vadd.f32 %v1891_v40, %v683_v18  ;;  %v795_v25 = vmax.f32 %v553_v11, 0.0  ;;  %v827_v26 = vmax.f32 %v681_v12, 0.0 }
 0x106   : > { %v798_v23 = vmax.f32 %v564_v15, 0.0  ;;  %v830_v24 = vmax.f32 %v692_v16, 0.0 }
 0x107   : > { %v796_v27 = vmax.f32 %v556_v19, 0.0  ;;  %v828_v28 = vmax.f32 %v684_v20, 0.0 }
 0x108   : > { %v1429_v29 = vpack.c.bf16 %v798_v23, %v797_v21  ;;  %v1509_v30 = vpack.c.bf16 %v830_v24, %v829_v22 }
 0x109   : > { %v1424_v31 = vpack.c.bf16 %v796_v27, %v795_v25  ;;  %v1504_v32 = vpack.c.bf16 %v828_v28, %v827_v26  ;;  %v1668_v33 = vpop.f32.mrb[8].mxu0  ;;  %v1700_v34 = vpop.f32.mrb[8].mxu1 }
 0x10a   : > { %1573 = vst [vmem:[%s1906_s13 + $0x18] sm:$0xff] %v1429_v29   ;;  %1589 = vst [vmem:[%s1906_s13 + $0x98] sm:$0xff] %v1509_v30   ;;  %v577_v35 = vadd.f32 %v1668_v33, %v1891_v40  ;;  %v705_v36 = vadd.f32 %v1700_v34, %v1891_v40  ;;  %v568_v37 = vpop.f32.mrb[9].mxu0  ;;  %v696_v38 = vpop.f32.mrb[9].mxu1 }
 0x10b   : > { %1572 = vst [vmem:[%s1906_s13 + $0x10] sm:$0xff] %v1424_v31   ;;  %1588 = vst [vmem:[%s1906_s13 + $0x90] sm:$0xff] %v1504_v32   ;;  %v569_v39 = vadd.f32 %v1891_v40, %v568_v37  ;;  %v697_v41 = vadd.f32 %v1891_v40, %v696_v38  ;;  %v1669_v42 = vpop.f32.mrb[10].mxu0  ;;  %v1701_v43 = vpop.f32.mrb[10].mxu1 }
 0x10c   : > { %v580_v44 = vadd.f32 %v1669_v42, %v1891_v40  ;;  %v708_v45 = vadd.f32 %v1701_v43, %v1891_v40  ;;  %v571_v46 = vpop.f32.mrb[11].mxu0  ;;  %v699_v47 = vpop.f32.mrb[11].mxu1  ;;  %v801_v50 = vmax.f32 %v577_v35, 0.0  ;;  %v833_v51 = vmax.f32 %v705_v36, 0.0 }
 0x10d   : > { %v572_v48 = vadd.f32 %v1891_v40, %v571_v46  ;;  %v700_v49 = vadd.f32 %v1891_v40, %v699_v47  ;;  %v799_v54 = vmax.f32 %v569_v39, 0.0  ;;  %v831_v55 = vmax.f32 %v697_v41, 0.0 }
 0x10e   : > { %v802_v52 = vmax.f32 %v580_v44, 0.0  ;;  %v834_v53 = vmax.f32 %v708_v45, 0.0 }
 0x10f   : > { %v800_v56 = vmax.f32 %v572_v48, 0.0  ;;  %v832_v57 = vmax.f32 %v700_v49, 0.0 }
 0x110   : > { %v1439_v58 = vpack.c.bf16 %v802_v52, %v801_v50  ;;  %v1519_v59 = vpack.c.bf16 %v834_v53, %v833_v51 }
 0x111   : > { %v1434_v60 = vpack.c.bf16 %v800_v56, %v799_v54  ;;  %v1514_v61 = vpack.c.bf16 %v832_v57, %v831_v55  ;;  %v1672_v62 = vpop.f32.mrb[12].mxu0  ;;  %v1704_v63 = vpop.f32.mrb[12].mxu1 }
 0x112   : > { %1575 = vst [vmem:[%s1906_s13 + $0x28] sm:$0xff] %v1439_v58   ;;  %1591 = vst [vmem:[%s1906_s13 + $0xa8] sm:$0xff] %v1519_v59   ;;  %v593_v0 = vadd.f32 %v1672_v62, %v1891_v40  ;;  %v721_v1 = vadd.f32 %v1704_v63, %v1891_v40  ;;  %v584_v2 = vpop.f32.mrb[13].mxu0  ;;  %v712_v3 = vpop.f32.mrb[13].mxu1 }
 0x113   : > { %1574 = vst [vmem:[%s1906_s13 + $0x20] sm:$0xff] %v1434_v60   ;;  %1590 = vst [vmem:[%s1906_s13 + $0xa0] sm:$0xff] %v1514_v61   ;;  %v585_v4 = vadd.f32 %v1891_v40, %v584_v2  ;;  %v713_v5 = vadd.f32 %v1891_v40, %v712_v3  ;;  %v1673_v6 = vpop.f32.mrb[14].mxu0  ;;  %v1705_v7 = vpop.f32.mrb[14].mxu1 }
 0x114   : > { %v596_v8 = vadd.f32 %v1673_v6, %v1891_v40  ;;  %v724_v9 = vadd.f32 %v1705_v7, %v1891_v40  ;;  %v587_v10 = vpop.f32.mrb[15].mxu0  ;;  %v715_v11 = vpop.f32.mrb[15].mxu1  ;;  %v805_v14 = vmax.f32 %v593_v0, 0.0  ;;  %v837_v15 = vmax.f32 %v721_v1, 0.0 }
 0x115   : > { %v588_v12 = vadd.f32 %v1891_v40, %v587_v10  ;;  %v716_v13 = vadd.f32 %v1891_v40, %v715_v11  ;;  %v803_v18 = vmax.f32 %v585_v4, 0.0  ;;  %v835_v19 = vmax.f32 %v713_v5, 0.0 }
 0x116   : > { %v806_v16 = vmax.f32 %v596_v8, 0.0  ;;  %v838_v17 = vmax.f32 %v724_v9, 0.0 }
 0x117   : > { %v804_v20 = vmax.f32 %v588_v12, 0.0  ;;  %v836_v21 = vmax.f32 %v716_v13, 0.0 }
 0x118   : > { %v1449_v22 = vpack.c.bf16 %v806_v16, %v805_v14  ;;  %v1529_v23 = vpack.c.bf16 %v838_v17, %v837_v15 }
 0x119   : > { %v1444_v24 = vpack.c.bf16 %v804_v20, %v803_v18  ;;  %v1524_v25 = vpack.c.bf16 %v836_v21, %v835_v19  ;;  %v1676_v26 = vpop.f32.mrb[16].mxu0  ;;  %v1708_v27 = vpop.f32.mrb[16].mxu1 }
 0x11a   : > { %1577 = vst [vmem:[%s1906_s13 + $0x38] sm:$0xff] %v1449_v22   ;;  %1593 = vst [vmem:[%s1906_s13 + $0xb8] sm:$0xff] %v1529_v23   ;;  %v609_v28 = vadd.f32 %v1676_v26, %v1891_v40  ;;  %v737_v29 = vadd.f32 %v1708_v27, %v1891_v40  ;;  %v600_v30 = vpop.f32.mrb[17].mxu0  ;;  %v728_v31 = vpop.f32.mrb[17].mxu1 }
 0x11b   : > { %1576 = vst [vmem:[%s1906_s13 + $0x30] sm:$0xff] %v1444_v24   ;;  %1592 = vst [vmem:[%s1906_s13 + $0xb0] sm:$0xff] %v1524_v25   ;;  %v601_v32 = vadd.f32 %v1891_v40, %v600_v30  ;;  %v729_v33 = vadd.f32 %v1891_v40, %v728_v31  ;;  %v1677_v34 = vpop.f32.mrb[18].mxu0  ;;  %v1709_v35 = vpop.f32.mrb[18].mxu1 }
 0x11c   : > { %v612_v36 = vadd.f32 %v1677_v34, %v1891_v40  ;;  %v740_v37 = vadd.f32 %v1709_v35, %v1891_v40  ;;  %v603_v38 = vpop.f32.mrb[19].mxu0  ;;  %v731_v39 = vpop.f32.mrb[19].mxu1  ;;  %v809_v43 = vmax.f32 %v609_v28, 0.0  ;;  %v841_v44 = vmax.f32 %v737_v29, 0.0 }
 0x11d   : > { %v604_v41 = vadd.f32 %v1891_v40, %v603_v38  ;;  %v732_v42 = vadd.f32 %v1891_v40, %v731_v39  ;;  %v807_v47 = vmax.f32 %v601_v32, 0.0  ;;  %v839_v48 = vmax.f32 %v729_v33, 0.0 }
 0x11e   : > { %v810_v45 = vmax.f32 %v612_v36, 0.0  ;;  %v842_v46 = vmax.f32 %v740_v37, 0.0 }
 0x11f   : > { %v808_v49 = vmax.f32 %v604_v41, 0.0  ;;  %v840_v50 = vmax.f32 %v732_v42, 0.0 }
 0x120   : > { %v1459_v51 = vpack.c.bf16 %v810_v45, %v809_v43  ;;  %v1539_v52 = vpack.c.bf16 %v842_v46, %v841_v44 }
 0x121   : > { %v1454_v53 = vpack.c.bf16 %v808_v49, %v807_v47  ;;  %v1534_v54 = vpack.c.bf16 %v840_v50, %v839_v48  ;;  %v1680_v55 = vpop.f32.mrb[20].mxu0  ;;  %v1712_v56 = vpop.f32.mrb[20].mxu1 }
 0x122   : > { %1579 = vst [vmem:[%s1906_s13 + $0x48] sm:$0xff] %v1459_v51   ;;  %1595 = vst [vmem:[%s1906_s13 + $0xc8] sm:$0xff] %v1539_v52   ;;  %v625_v57 = vadd.f32 %v1680_v55, %v1891_v40  ;;  %v753_v58 = vadd.f32 %v1712_v56, %v1891_v40  ;;  %v616_v59 = vpop.f32.mrb[21].mxu0  ;;  %v744_v60 = vpop.f32.mrb[21].mxu1 }
 0x123   : > { %1578 = vst [vmem:[%s1906_s13 + $0x40] sm:$0xff] %v1454_v53   ;;  %1594 = vst [vmem:[%s1906_s13 + $0xc0] sm:$0xff] %v1534_v54   ;;  %v617_v61 = vadd.f32 %v1891_v40, %v616_v59  ;;  %v745_v62 = vadd.f32 %v1891_v40, %v744_v60  ;;  %v1681_v63 = vpop.f32.mrb[22].mxu0  ;;  %v1713_v0 = vpop.f32.mrb[22].mxu1 }
 0x124   : > { %v628_v1 = vadd.f32 %v1681_v63, %v1891_v40  ;;  %v756_v2 = vadd.f32 %v1713_v0, %v1891_v40  ;;  %v619_v3 = vpop.f32.mrb[23].mxu0  ;;  %v747_v4 = vpop.f32.mrb[23].mxu1  ;;  %v813_v7 = vmax.f32 %v625_v57, 0.0  ;;  %v845_v8 = vmax.f32 %v753_v58, 0.0 }
 0x125   : > { %v620_v5 = vadd.f32 %v1891_v40, %v619_v3  ;;  %v748_v6 = vadd.f32 %v1891_v40, %v747_v4  ;;  %v811_v11 = vmax.f32 %v617_v61, 0.0  ;;  %v843_v12 = vmax.f32 %v745_v62, 0.0 }
 0x126   : > { %v814_v9 = vmax.f32 %v628_v1, 0.0  ;;  %v846_v10 = vmax.f32 %v756_v2, 0.0 }
 0x127   : > { %v812_v13 = vmax.f32 %v620_v5, 0.0  ;;  %v844_v14 = vmax.f32 %v748_v6, 0.0 }
 0x128   : > { %v1469_v15 = vpack.c.bf16 %v814_v9, %v813_v7  ;;  %v1549_v16 = vpack.c.bf16 %v846_v10, %v845_v8 }
 0x129   : > { %v1464_v17 = vpack.c.bf16 %v812_v13, %v811_v11  ;;  %v1544_v18 = vpack.c.bf16 %v844_v14, %v843_v12  ;;  %v1684_v19 = vpop.f32.mrb[24].mxu0  ;;  %v1716_v20 = vpop.f32.mrb[24].mxu1 }
 0x12a   : > { %1581 = vst [vmem:[%s1906_s13 + $0x58] sm:$0xff] %v1469_v15   ;;  %1597 = vst [vmem:[%s1906_s13 + $0xd8] sm:$0xff] %v1549_v16   ;;  %v641_v21 = vadd.f32 %v1684_v19, %v1891_v40  ;;  %v769_v22 = vadd.f32 %v1716_v20, %v1891_v40  ;;  %v632_v23 = vpop.f32.mrb[25].mxu0  ;;  %v760_v24 = vpop.f32.mrb[25].mxu1 }
 0x12b   : > { %1580 = vst [vmem:[%s1906_s13 + $0x50] sm:$0xff] %v1464_v17   ;;  %1596 = vst [vmem:[%s1906_s13 + $0xd0] sm:$0xff] %v1544_v18   ;;  %v633_v25 = vadd.f32 %v1891_v40, %v632_v23  ;;  %v761_v26 = vadd.f32 %v1891_v40, %v760_v24  ;;  %v1685_v27 = vpop.f32.mrb[26].mxu0  ;;  %v1717_v28 = vpop.f32.mrb[26].mxu1 }
 0x12c   : > { %v644_v29 = vadd.f32 %v1685_v27, %v1891_v40  ;;  %v772_v30 = vadd.f32 %v1717_v28, %v1891_v40  ;;  %v635_v31 = vpop.f32.mrb[27].mxu0  ;;  %v763_v32 = vpop.f32.mrb[27].mxu1  ;;  %v817_v35 = vmax.f32 %v641_v21, 0.0  ;;  %v849_v36 = vmax.f32 %v769_v22, 0.0 }
 0x12d   : > { %v636_v33 = vadd.f32 %v1891_v40, %v635_v31  ;;  %v764_v34 = vadd.f32 %v1891_v40, %v763_v32  ;;  %v815_v39 = vmax.f32 %v633_v25, 0.0  ;;  %v847_v41 = vmax.f32 %v761_v26, 0.0 }
 0x12e   : > { %v818_v37 = vmax.f32 %v644_v29, 0.0  ;;  %v850_v38 = vmax.f32 %v772_v30, 0.0 }
 0x12f   : > { %v816_v42 = vmax.f32 %v636_v33, 0.0  ;;  %v848_v43 = vmax.f32 %v764_v34, 0.0 }
 0x130   : > { %v1479_v44 = vpack.c.bf16 %v818_v37, %v817_v35  ;;  %v1559_v45 = vpack.c.bf16 %v850_v38, %v849_v36 }
 0x131   : > { %v1474_v46 = vpack.c.bf16 %v816_v42, %v815_v39  ;;  %v1554_v47 = vpack.c.bf16 %v848_v43, %v847_v41  ;;  %v1688_v48 = vpop.f32.mrb[28].mxu0  ;;  %v1720_v49 = vpop.f32.mrb[28].mxu1 }
 0x132   : > { %1583 = vst [vmem:[%s1906_s13 + $0x68] sm:$0xff] %v1479_v44   ;;  %1599 = vst [vmem:[%s1906_s13 + $0xe8] sm:$0xff] %v1559_v45   ;;  %v657_v50 = vadd.f32 %v1688_v48, %v1891_v40  ;;  %v785_v51 = vadd.f32 %v1720_v49, %v1891_v40  ;;  %v648_v52 = vpop.f32.mrb[29].mxu0  ;;  %v776_v53 = vpop.f32.mrb[29].mxu1 }
 0x133   : > { %1582 = vst [vmem:[%s1906_s13 + $0x60] sm:$0xff] %v1474_v46   ;;  %1598 = vst [vmem:[%s1906_s13 + $0xe0] sm:$0xff] %v1554_v47   ;;  %v649_v54 = vadd.f32 %v1891_v40, %v648_v52  ;;  %v777_v55 = vadd.f32 %v1891_v40, %v776_v53  ;;  %v1689_v56 = vpop.f32.mrb[30].mxu0  ;;  %v1721_v57 = vpop.f32.mrb[30].mxu1 }
 0x134   : > { %v660_v58 = vadd.f32 %v1689_v56, %v1891_v40  ;;  %v788_v59 = vadd.f32 %v1721_v57, %v1891_v40  ;;  %v651_v60 = vpop.f32.mrb[31].mxu0  ;;  %v779_v61 = vpop.f32.mrb[31].mxu1  ;;  %v821_v0 = vmax.f32 %v657_v50, 0.0  ;;  %v853_v1 = vmax.f32 %v785_v51, 0.0 }
 0x135   : > { %v652_v62 = vadd.f32 %v1891_v40, %v651_v60  ;;  %v780_v63 = vadd.f32 %v1891_v40, %v779_v61  ;;  %v819_v4 = vmax.f32 %v649_v54, 0.0  ;;  %v851_v5 = vmax.f32 %v777_v55, 0.0 }
 0x136   : > { %v822_v2 = vmax.f32 %v660_v58, 0.0  ;;  %v854_v3 = vmax.f32 %v788_v59, 0.0 }
 0x137   : > { %v820_v6 = vmax.f32 %v652_v62, 0.0  ;;  %v852_v7 = vmax.f32 %v780_v63, 0.0 }
 0x138   : > { %v1489_v8 = vpack.c.bf16 %v822_v2, %v821_v0  ;;  %v1569_v9 = vpack.c.bf16 %v854_v3, %v853_v1 }
 0x139   : > { %v1484_v10 = vpack.c.bf16 %v820_v6, %v819_v4  ;;  %v1564_v11 = vpack.c.bf16 %v852_v7, %v851_v5 }
 0x13a   : > { %1585 = vst [vmem:[%s1906_s13 + $0x78] sm:$0xff] %v1489_v8   ;;  %1601 = vst [vmem:[%s1906_s13 + $0xf8] sm:$0xff] %v1569_v9  }
 0x13b   : > { %1584 = vst [vmem:[%s1906_s13 + $0x70] sm:$0xff] %v1484_v10   ;;  %1600 = vst [vmem:[%s1906_s13 + $0xf0] sm:$0xff] %v1564_v11  }
 0x13c PF: > { %s13_s12 = sadd.s32 1, %s1792_s12  }
 0x13d   : > { %p10_p4 = scmp.ge.s32.totalorder %s13_s12, 4  }
 0x13f   :  { %12 = sbr.rel (!%p10_p4) target bundleno = 1 (0x1), region = 62 }

// kernel: _lambda_.3
= control target key start
LH: loop header
LB: loop body
LE: loop exit
PB: predicated region body
PF: predicated region fallthrough
CT: control target
= control target key end

     0   :  { %8 = vsyncpa [#allocation3], 0  ;;  %s2074_s0 = inlined_call_operand.vmem [shape: bf16[1024,256], index: 0, kind: input, shape index: {}]   ;;  %s2075_s1 = inlined_call_operand.vmem [shape: bf16[256,128], index: 1, kind: input, shape index: {}]   ;;  %s2076_s2 = inlined_call_operand.vmem [shape: f32[1,128], index: 2, kind: input, shape index: {}]   ;;  %s2077_s3 = inlined_call_operand.hbm [shape: f32[1024,128], index: 3, kind: output, shape index: {}]  }
   0x1   :  { %10 = vsyncpa [#allocation3 + $0x1], 0  ;;  %s1686_s12 = smov 0   ;;  %s1688_s13 = smov 0  }
   0x2   :  { %s1690_s14 = smov 0   ;;  %s1692_s15 = smov 0  }
   0x3 LB: > { %s1707_s16 = sadd.s32 4294967295, %s1660_s15   ;;  %s1316_s17 = sadd.s32 4294967294, %s1660_s15   ;;  %s1660_s15 = sphi %s1692_s15, %s2083_s15   ;;  %s1656_s14 = sphi %s1690_s14, %s2082_s14   ;;  %s1652_s13 = sphi %s1688_s13, %s2081_s13   ;;  %s1648_s12 = sphi %s1686_s12, %s2080_s12  }
   0x4   : > { %s1711_s18 = sadd.s32 1, %s1660_s15   ;;  %s91_s19 = sadd.s32 1, %s1656_s14 }
   0x5   : > { %s88_s20 = ssub.s32 %s1660_s15, %s1711_s18  ;;  %p101_p0 = scmp.ne.s32.totalorder %s1656_s14, %s1652_s13 }
   0x6   : > { %p89_p1 = scmp.eq.s32.totalorder %s88_s20, 0  ;;  %p102_p2 = scmp.eq.s32.totalorder %s1707_s16, 1 }
   0x7   : > { %p107_p3 = scmp.ne.s32.totalorder %s1652_s13, %s1648_s12  ;;  %p108_p4 = scmp.eq.s32.totalorder %s1316_s17, 1 }
   0x8   : > { %s1722_s21 = scalar_select %p89_p1, %s1656_s14, %s91_s19  }
   0x9   : > { %p1724_p5 = por %p102_p2, %p101_p0  ;;  %p1728_p6 = por %p108_p4, %p107_p3 }
   0xa   : > { %p1319_p7 = scmp.ge.s32.totalorder %s1660_s15, 1  ;;  %p142_p8 = scmp.lt.s32.totalorder %s1660_s15, 3 }
   0xc   : > { %p143_p9 = pnand %p1319_p7, %p142_p8 }
   0xd   : > { %v1486_v0 = vld [vmem:[%s2075_s1] sm:$0xff] (!%p143_p9)   ;;  %v1662_v1 = vmov (!%p143_p9), 0   ;;  %s1321_s26 = sshll.u32 (!%p143_p9), %s1707_s16, 6  ;;  %v1487_v2 = vld [vmem:[%s2075_s1 + $0x8] sm:$0xff] (!%p143_p9)   ;;  %v1488_v3 = vld [vmem:[%s2075_s1 + $0x10] sm:$0xff] (!%p143_p9)   ;;  %s1411_s30 = sshll.u32 (!%p143_p9), %s1707_s16, 13 }
   0xe   : > { %146 = sbr.rel (%p143_p9) target bundleno = 434 (0x1b2), region = 32  ;;  %695 = vmatprep.subr.bf16.mxu0 (!%p143_p9), %v1662_v1  ;;  %1412 = vmatprep.subr.bf16.mxu1 (!%p143_p9), %v1662_v1  ;;  %p168_p10 = scmp.lt.s32.totalorder (!%p143_p9), %s1321_s26, 127  ;;  %v1489_v4 = vld [vmem:[%s2075_s1 + $0x18] sm:$0xff] (!%p143_p9)   ;;  %v1490_v5 = vld [vmem:[%s2075_s1 + $0x20] sm:$0xff] (!%p143_p9)   ;;  %v1491_v7 = vld [vmem:[%s2075_s1 + $0x28] sm:$0xff] (!%p143_p9)  }
   0xf   : > { %696 = vmatpush1.bf16.msra.mxu0 (!%p143_p9), %v1486_v0  ;;  %1428 = vmatpush1.bf16.msra.mxu1 (!%p143_p9), %v1486_v0  ;;  %v1492_v9 = vld [vmem:[%s2075_s1 + $0x30] sm:$0xff] (!%p143_p9)   ;;  %v1493_v10 = vld [vmem:[%s2075_s1 + $0x38] sm:$0xff] (!%p143_p9)   ;;  %v1494_v11 = vld [vmem:[%s2075_s1 + $0x40] sm:$0xff] (!%p143_p9)   ;;  %s1663_s9 = smov (!%p143_p9), [#allocation2]  }
  0x10   : > { %697 = vmatprep.subr.bf16.mxu0 (!%p143_p9), %v1662_v1  ;;  %1413 = vmatprep.subr.bf16.mxu1 (!%p143_p9), %v1662_v1  ;;  %v1495_v12 = vld [vmem:[%s2075_s1 + $0x48] sm:$0xff] (!%p143_p9)   ;;  %v1496_v13 = vld [vmem:[%s2075_s1 + $0x50] sm:$0xff] (!%p143_p9)   ;;  %v1497_v14 = vld [vmem:[%s2075_s1 + $0x58] sm:$0xff] (!%p143_p9)   ;;  %s1602_s10 = sshll.u32 (!%p143_p9), %s1663_s9, 4  ;;  %s1603_s10 = int_to_ptr.vmem [resolvable:$false] %s1602_s10 }
  0x11   : > { %v1498_v15 = vld [vmem:[%s2075_s1 + $0x60] sm:$0xff] (!%p143_p9)   ;;  %v1499_v16 = vld [vmem:[%s2075_s1 + $0x68] sm:$0xff] (!%p143_p9)   ;;  %v1500_v17 = vld [vmem:[%s2075_s1 + $0x70] sm:$0xff] (!%p143_p9)   ;;  %s1604_s17 = scalar_lea.vmem (!%p143_p9), %s1603_s10, 16384 }
  0x12   : > { %v1501_v18 = vld [vmem:[%s2075_s1 + $0x78] sm:$0xff] (!%p143_p9)  }
  0x13   : > { %698 = vmatpush1.bf16.msra.mxu0 (!%p143_p9), %v1487_v2  ;;  %1429 = vmatpush1.bf16.msra.mxu1 (!%p143_p9), %v1487_v2 }
  0x14   : > { %699 = vmatprep.subr.bf16.mxu0 (!%p143_p9), %v1662_v1  ;;  %1414 = vmatprep.subr.bf16.mxu1 (!%p143_p9), %v1662_v1 }
  0x15   : > { %s2085_s26 = smov (!%p168_p10, %s1321_s26), 127 }
  0x16   : > { %s1410_s6 = sshll.u32 %s2085_s26, 3  ;;  %s164_s26 = sand.u32 1, %s1652_s13  }
  0x17   : > { %700 = vmatpush1.bf16.msra.mxu0 %v1488_v3  ;;  %1430 = vmatpush1.bf16.msra.mxu1 %v1488_v3  ;;  %s1761_s11 = scalar_lea.vmem %s2074_s0, %s1410_s6  ;;  %s1320_s29 = sshll.u32 %s164_s26, 9 }
  0x18   : > { %701 = vmatprep.subr.bf16.mxu0 %v1662_v1  ;;  %1415 = vmatprep.subr.bf16.mxu1 %v1662_v1  ;;  %v1504_v6 = vld [vmem:[%s1761_s11 + $0x4] ss:$8 sps:$4 sm:$0xff]   ;;  %v1502_v19 = vld [vmem:[%s1761_s11] ss:$8 sps:$4 sm:$0xff]   ;;  %v1508_v21 = vld [vmem:[%s1761_s11 + $0x14] ss:$8 sps:$4 sm:$0xff]   ;;  %s2025_s6 = scalar_lea.hbm %s2077_s3, %s1411_s30 }
  0x19   : > { %v1507_v8 = vld [vmem:[%s1761_s11 + $0x104] ss:$8 sps:$4 sm:$0xff]   ;;  %727 = vmatprep.mubr.bf16.mxu0 %v1504_v6  ;;  %v1505_v20 = vld [vmem:[%s1761_s11 + $0x100] ss:$8 sps:$4 sm:$0xff]   ;;  %v1510_v22 = vld [vmem:[%s1761_s11 + $0x114] ss:$8 sps:$4 sm:$0xff]  }
  0x1a   : > { %855 = vmatprep.mubr.bf16.mxu1 %v1507_v8  ;;  %v1512_v23 = vld [vmem:[%s1761_s11 + $0x10] ss:$8 sps:$4 sm:$0xff]   ;;  %v1514_v25 = vld [vmem:[%s1761_s11 + $0x24] ss:$8 sps:$4 sm:$0xff]   ;;  %v1518_v27 = vld [vmem:[%s1761_s11 + $0x20] ss:$8 sps:$4 sm:$0xff]  }
  0x1b   : > { %702 = vmatpush1.bf16.msra.mxu0 %v1489_v4  ;;  %1431 = vmatpush1.bf16.msra.mxu1 %v1489_v4  ;;  %v1513_v24 = vld [vmem:[%s1761_s11 + $0x110] ss:$8 sps:$4 sm:$0xff]   ;;  %v1516_v26 = vld [vmem:[%s1761_s11 + $0x124] ss:$8 sps:$4 sm:$0xff]   ;;  %v1519_v28 = vld [vmem:[%s1761_s11 + $0x120] ss:$8 sps:$4 sm:$0xff]  }
  0x1c   : > { %703 = vmatprep.subr.bf16.mxu0 %v1662_v1  ;;  %1416 = vmatprep.subr.bf16.mxu1 %v1662_v1  ;;  %v1520_v29 = vld [vmem:[%s1761_s11 + $0x34] ss:$8 sps:$4 sm:$0xff]   ;;  %v1524_v31 = vld [vmem:[%s1761_s11 + $0x30] ss:$8 sps:$4 sm:$0xff]   ;;  %v1526_v33 = vld [vmem:[%s1761_s11 + $0x44] ss:$8 sps:$4 sm:$0xff]  }
  0x1d   : > { %v1522_v30 = vld [vmem:[%s1761_s11 + $0x134] ss:$8 sps:$4 sm:$0xff]   ;;  %v1525_v32 = vld [vmem:[%s1761_s11 + $0x130] ss:$8 sps:$4 sm:$0xff]   ;;  %v1528_v34 = vld [vmem:[%s1761_s11 + $0x144] ss:$8 sps:$4 sm:$0xff]  }
  0x1e   : > { %v1530_v35 = vld [vmem:[%s1761_s11 + $0x40] ss:$8 sps:$4 sm:$0xff]   ;;  %v1532_v37 = vld [vmem:[%s1761_s11 + $0x54] ss:$8 sps:$4 sm:$0xff]   ;;  %v1536_v39 = vld [vmem:[%s1761_s11 + $0x50] ss:$8 sps:$4 sm:$0xff]  }
  0x1f   : > { %704 = vmatpush1.bf16.msra.mxu0 %v1490_v5  ;;  %1432 = vmatpush1.bf16.msra.mxu1 %v1490_v5  ;;  %v1531_v36 = vld [vmem:[%s1761_s11 + $0x140] ss:$8 sps:$4 sm:$0xff]   ;;  %v1534_v38 = vld [vmem:[%s1761_s11 + $0x154] ss:$8 sps:$4 sm:$0xff]   ;;  %v1537_v40 = vld [vmem:[%s1761_s11 + $0x150] ss:$8 sps:$4 sm:$0xff]  }
  0x20   : > { %705 = vmatprep.subr.bf16.mxu0 %v1662_v1  ;;  %1417 = vmatprep.subr.bf16.mxu1 %v1662_v1  ;;  %v1538_v41 = vld [vmem:[%s1761_s11 + $0x64] ss:$8 sps:$4 sm:$0xff]   ;;  %v1542_v43 = vld [vmem:[%s1761_s11 + $0x60] ss:$8 sps:$4 sm:$0xff]   ;;  %v1544_v45 = vld [vmem:[%s1761_s11 + $0x74] ss:$8 sps:$4 sm:$0xff]  }
  0x21   : > { %v1540_v42 = vld [vmem:[%s1761_s11 + $0x164] ss:$8 sps:$4 sm:$0xff]   ;;  %v1543_v44 = vld [vmem:[%s1761_s11 + $0x160] ss:$8 sps:$4 sm:$0xff]   ;;  %v1546_v46 = vld [vmem:[%s1761_s11 + $0x174] ss:$8 sps:$4 sm:$0xff]  }
  0x22   : > { %v1548_v47 = vld [vmem:[%s1761_s11 + $0x70] ss:$8 sps:$4 sm:$0xff]   ;;  %v1550_v49 = vld [vmem:[%s1761_s11 + $0x84] ss:$8 sps:$4 sm:$0xff]   ;;  %v1554_v51 = vld [vmem:[%s1761_s11 + $0x80] ss:$8 sps:$4 sm:$0xff]  }
  0x23   : > { %706 = vmatpush1.bf16.msra.mxu0 %v1491_v7  ;;  %1433 = vmatpush1.bf16.msra.mxu1 %v1491_v7  ;;  %v1549_v48 = vld [vmem:[%s1761_s11 + $0x170] ss:$8 sps:$4 sm:$0xff]   ;;  %v1552_v50 = vld [vmem:[%s1761_s11 + $0x184] ss:$8 sps:$4 sm:$0xff]   ;;  %v1555_v52 = vld [vmem:[%s1761_s11 + $0x180] ss:$8 sps:$4 sm:$0xff]  }
  0x24   : > { %707 = vmatprep.subr.bf16.mxu0 %v1662_v1  ;;  %1418 = vmatprep.subr.bf16.mxu1 %v1662_v1  ;;  %v1556_v53 = vld [vmem:[%s1761_s11 + $0x94] ss:$8 sps:$4 sm:$0xff]   ;;  %v1560_v55 = vld [vmem:[%s1761_s11 + $0x90] ss:$8 sps:$4 sm:$0xff]   ;;  %v1562_v57 = vld [vmem:[%s1761_s11 + $0xa4] ss:$8 sps:$4 sm:$0xff]  }
  0x25   : > { %v1558_v54 = vld [vmem:[%s1761_s11 + $0x194] ss:$8 sps:$4 sm:$0xff]   ;;  %v1561_v56 = vld [vmem:[%s1761_s11 + $0x190] ss:$8 sps:$4 sm:$0xff]   ;;  %v1564_v58 = vld [vmem:[%s1761_s11 + $0x1a4] ss:$8 sps:$4 sm:$0xff]  }
  0x26   : > { %v1566_v59 = vld [vmem:[%s1761_s11 + $0xa0] ss:$8 sps:$4 sm:$0xff]   ;;  %v1568_v61 = vld [vmem:[%s1761_s11 + $0xb4] ss:$8 sps:$4 sm:$0xff]   ;;  %v1572_v63 = vld [vmem:[%s1761_s11 + $0xb0] ss:$8 sps:$4 sm:$0xff]  }
  0x27   : > { %708 = vmatpush1.bf16.msra.mxu0 %v1492_v9  ;;  %1434 = vmatpush1.bf16.msra.mxu1 %v1492_v9  ;;  %v1567_v60 = vld [vmem:[%s1761_s11 + $0x1a0] ss:$8 sps:$4 sm:$0xff]   ;;  %v1570_v62 = vld [vmem:[%s1761_s11 + $0x1b4] ss:$8 sps:$4 sm:$0xff]   ;;  %v1573_v0 = vld [vmem:[%s1761_s11 + $0x1b0] ss:$8 sps:$4 sm:$0xff]  }
  0x28   : > { %709 = vmatprep.subr.bf16.mxu0 %v1662_v1  ;;  %1419 = vmatprep.subr.bf16.mxu1 %v1662_v1  ;;  %v1576_v2 = vld [vmem:[%s1761_s11 + $0x1c4] ss:$8 sps:$4 sm:$0xff]   ;;  %v1578_v3 = vld [vmem:[%s1761_s11 + $0xc0] ss:$8 sps:$4 sm:$0xff]   ;;  %v1580_v5 = vld [vmem:[%s1761_s11 + $0xd4] ss:$8 sps:$4 sm:$0xff]  }
  0x29   : > { %v1579_v4 = vld [vmem:[%s1761_s11 + $0x1c0] ss:$8 sps:$4 sm:$0xff]   ;;  %v1582_v6 = vld [vmem:[%s1761_s11 + $0x1d4] ss:$8 sps:$4 sm:$0xff]   ;;  %v1584_v7 = vld [vmem:[%s1761_s11 + $0xd0] ss:$8 sps:$4 sm:$0xff]  }
  0x2a   : > { %v1585_v8 = vld [vmem:[%s1761_s11 + $0x1d0] ss:$8 sps:$4 sm:$0xff]   ;;  %v1586_v9 = vld [vmem:[%s1761_s11 + $0xe4] ss:$8 sps:$4 sm:$0xff]   ;;  %s2033_s7 = scalar_lea.sflag [#allocation3], %s164_s26 }
  0x2b   : > { %710 = vmatpush1.bf16.msra.mxu0 %v1493_v10  ;;  %1435 = vmatpush1.bf16.msra.mxu1 %v1493_v10  ;;  %v1588_v10 = vld [vmem:[%s1761_s11 + $0x1e4] ss:$8 sps:$4 sm:$0xff]  }
  0x2c   : > { %711 = vmatprep.subr.bf16.mxu0 %v1662_v1  ;;  %1420 = vmatprep.subr.bf16.mxu1 %v1662_v1 }
  0x2f   : > { %712 = vmatpush1.bf16.msra.mxu0 %v1494_v11  ;;  %1436 = vmatpush1.bf16.msra.mxu1 %v1494_v11  ;;  %v1590_v11 = vld [vmem:[%s1761_s11 + $0xe0] ss:$8 sps:$4 sm:$0xff]  }
  0x30   : > { %713 = vmatprep.subr.bf16.mxu0 %v1662_v1  ;;  %1421 = vmatprep.subr.bf16.mxu1 %v1662_v1 }
  0x33   : > { %714 = vmatpush1.bf16.msra.mxu0 %v1495_v12  ;;  %1437 = vmatpush1.bf16.msra.mxu1 %v1495_v12  ;;  %v1591_v12 = vld [vmem:[%s1761_s11 + $0x1e0] ss:$8 sps:$4 sm:$0xff]  }
  0x34   : > { %715 = vmatprep.subr.bf16.mxu0 %v1662_v1  ;;  %1422 = vmatprep.subr.bf16.mxu1 %v1662_v1 }
  0x37   : > { %716 = vmatpush1.bf16.msra.mxu0 %v1496_v13  ;;  %1438 = vmatpush1.bf16.msra.mxu1 %v1496_v13  ;;  %v1592_v13 = vld [vmem:[%s1761_s11 + $0xf4] ss:$8 sps:$4 sm:$0xff]  }
  0x38   : > { %717 = vmatprep.subr.bf16.mxu0 %v1662_v1  ;;  %1423 = vmatprep.subr.bf16.mxu1 %v1662_v1 }
  0x3b   : > { %718 = vmatpush1.bf16.msra.mxu0 %v1497_v14  ;;  %1439 = vmatpush1.bf16.msra.mxu1 %v1497_v14  ;;  %v1594_v14 = vld [vmem:[%s1761_s11 + $0x1f4] ss:$8 sps:$4 sm:$0xff]  }
  0x3c   : > { %719 = vmatprep.subr.bf16.mxu0 %v1662_v1  ;;  %1424 = vmatprep.subr.bf16.mxu1 %v1662_v1 }
  0x3f   : > { %720 = vmatpush1.bf16.msra.mxu0 %v1498_v15  ;;  %1440 = vmatpush1.bf16.msra.mxu1 %v1498_v15  ;;  %v1596_v15 = vld [vmem:[%s1761_s11 + $0xf0] ss:$8 sps:$4 sm:$0xff]  }
  0x40   : > { %721 = vmatprep.subr.bf16.mxu0 %v1662_v1  ;;  %1425 = vmatprep.subr.bf16.mxu1 %v1662_v1 }
  0x43   : > { %722 = vmatpush1.bf16.msra.mxu0 %v1499_v16  ;;  %1441 = vmatpush1.bf16.msra.mxu1 %v1499_v16  ;;  %v1597_v16 = vld [vmem:[%s1761_s11 + $0x1f0] ss:$8 sps:$4 sm:$0xff]  }
  0x44   : > { %723 = vmatprep.subr.bf16.mxu0 %v1662_v1  ;;  %1426 = vmatprep.subr.bf16.mxu1 %v1662_v1 }
  0x47   : > { %724 = vmatpush1.bf16.msra.mxu0 %v1500_v17  ;;  %1442 = vmatpush1.bf16.msra.mxu1 %v1500_v17  ;;  %v1888_v17 = vld [vmem:[%s2076_s2] ss:$0 sm:$0xff] }
  0x48   : > { %725 = vmatprep.subr.bf16.mxu0 %v1662_v1  ;;  %1427 = vmatprep.subr.bf16.mxu1 %v1662_v1  ;;  %v1574_v1 = vld [vmem:[%s1761_s11 + $0xc4] ss:$8 sps:$4 sm:$0xff]   ;;  %s1896_s11 = scalar_lea.vmem [#allocation2], %s1320_s29 }
  0x49   : > { %s1254_s4 = sshll.u32 %s1896_s11, 4  ;;  %s2027_s4 = int_to_ptr.vmem [resolvable:$true] %s1254_s4 }
  0x4a   : > { %s1598_s8 = scalar_lea.vmem %s2027_s4, 8192  ;;  %p1605_p0 = scmp.lt.s32.totalorder %s2027_s4, %s1603_s10 }
  0x4b   : > { %726 = vmatpush1.bf16.msra.mxu0 %v1501_v18  ;;  %1443 = vmatpush1.bf16.msra.mxu1 %v1501_v18  ;;  %p1599_p11 = scmp.ne.s32.totalorder %s2027_s4, %s1598_s8  ;;  %p1606_p1 = scmp.lt.s32.totalorder %s1604_s17, %s1598_s8 }
  0x4d   : > { %p1600_p12 = pnand %p1599_p11, %p1724_p5  ;;  %p1607_p2 = por %p1606_p1, %p1605_p0 }
  0x4e   : > { %728 = vmatmul.mubr.bf16.vlgmr.msra.gmra.mrb[0].mxu0 %v1502_v19  ;;  %856 = vmatmul.mubr.bf16.vlgmr.msra.gmra.mrb[0].mxu1 %v1505_v20 }
  0x4f   : > { %735 = vmatprep.mubr.bf16.mxu0 %v1508_v21  ;;  %863 = vmatprep.mubr.bf16.mxu1 %v1510_v22  ;;  %p1601_p13 = pneg %p1600_p12 }
  0x51   : > { %p1608_p3 = pnand %p1607_p2, %p1601_p13 }
  0x56   : > { %736 = vmatmul.mubr.bf16.gmra.mrb[4].mxu0 %v1512_v23  ;;  %864 = vmatmul.mubr.bf16.gmra.mrb[4].mxu1 %v1513_v24 }
  0x57   : > { %743 = vmatprep.mubr.bf16.mxu0 %v1514_v25  ;;  %871 = vmatprep.mubr.bf16.mxu1 %v1516_v26 }
  0x5e   : > { %744 = vmatmul.mubr.bf16.gmra.mrb[8].mxu0 %v1518_v27  ;;  %872 = vmatmul.mubr.bf16.gmra.mrb[8].mxu1 %v1519_v28 }
  0x5f   : > { %751 = vmatprep.mubr.bf16.mxu0 %v1520_v29  ;;  %879 = vmatprep.mubr.bf16.mxu1 %v1522_v30 }
  0x66   : > { %752 = vmatmul.mubr.bf16.gmra.mrb[12].mxu0 %v1524_v31  ;;  %880 = vmatmul.mubr.bf16.gmra.mrb[12].mxu1 %v1525_v32 }
  0x67   : > { %759 = vmatprep.mubr.bf16.mxu0 %v1526_v33  ;;  %887 = vmatprep.mubr.bf16.mxu1 %v1528_v34 }
  0x6e   : > { %760 = vmatmul.mubr.bf16.gmra.mrb[16].mxu0 %v1530_v35  ;;  %888 = vmatmul.mubr.bf16.gmra.mrb[16].mxu1 %v1531_v36 }
  0x6f   : > { %767 = vmatprep.mubr.bf16.mxu0 %v1532_v37  ;;  %895 = vmatprep.mubr.bf16.mxu1 %v1534_v38 }
  0x76   : > { %768 = vmatmul.mubr.bf16.gmra.mrb[20].mxu0 %v1536_v39  ;;  %896 = vmatmul.mubr.bf16.gmra.mrb[20].mxu1 %v1537_v40 }
  0x77   : > { %775 = vmatprep.mubr.bf16.mxu0 %v1538_v41  ;;  %903 = vmatprep.mubr.bf16.mxu1 %v1540_v42 }
  0x7e   : > { %776 = vmatmul.mubr.bf16.gmra.mrb[24].mxu0 %v1542_v43  ;;  %904 = vmatmul.mubr.bf16.gmra.mrb[24].mxu1 %v1543_v44 }
  0x7f   : > { %783 = vmatprep.mubr.bf16.mxu0 %v1544_v45  ;;  %911 = vmatprep.mubr.bf16.mxu1 %v1546_v46 }
  0x86   : > { %784 = vmatmul.mubr.bf16.gmra.mrb[28].mxu0 %v1548_v47  ;;  %912 = vmatmul.mubr.bf16.gmra.mrb[28].mxu1 %v1549_v48 }
  0x87   : > { %791 = vmatprep.mubr.bf16.mxu0 %v1550_v49  ;;  %919 = vmatprep.mubr.bf16.mxu1 %v1552_v50 }
  0x8e   : > { %792 = vmatmul.mubr.bf16.gmra.mrb[32].mxu0 %v1554_v51  ;;  %920 = vmatmul.mubr.bf16.gmra.mrb[32].mxu1 %v1555_v52 }
  0x8f   : > { %799 = vmatprep.mubr.bf16.mxu0 %v1556_v53  ;;  %927 = vmatprep.mubr.bf16.mxu1 %v1558_v54 }
  0x96   : > { %800 = vmatmul.mubr.bf16.gmra.mrb[36].mxu0 %v1560_v55  ;;  %928 = vmatmul.mubr.bf16.gmra.mrb[36].mxu1 %v1561_v56 }
  0x97   : > { %807 = vmatprep.mubr.bf16.mxu0 %v1562_v57  ;;  %935 = vmatprep.mubr.bf16.mxu1 %v1564_v58 }
  0x9e   : > { %808 = vmatmul.mubr.bf16.gmra.mrb[40].mxu0 %v1566_v59  ;;  %936 = vmatmul.mubr.bf16.gmra.mrb[40].mxu1 %v1567_v60 }
  0x9f   : > { %815 = vmatprep.mubr.bf16.mxu0 %v1568_v61  ;;  %943 = vmatprep.mubr.bf16.mxu1 %v1570_v62 }
  0xa6   : > { %816 = vmatmul.mubr.bf16.gmra.mrb[44].mxu0 %v1572_v63  ;;  %944 = vmatmul.mubr.bf16.gmra.mrb[44].mxu1 %v1573_v0 }
  0xa7   : > { %823 = vmatprep.mubr.bf16.mxu0 %v1574_v1  ;;  %951 = vmatprep.mubr.bf16.mxu1 %v1576_v2 }
  0xae   : > { %824 = vmatmul.mubr.bf16.gmra.mrb[48].mxu0 %v1578_v3  ;;  %952 = vmatmul.mubr.bf16.gmra.mrb[48].mxu1 %v1579_v4 }
  0xaf   : > { %831 = vmatprep.mubr.bf16.mxu0 %v1580_v5  ;;  %959 = vmatprep.mubr.bf16.mxu1 %v1582_v6 }
  0xb6   : > { %832 = vmatmul.mubr.bf16.gmra.mrb[52].mxu0 %v1584_v7  ;;  %960 = vmatmul.mubr.bf16.gmra.mrb[52].mxu1 %v1585_v8 }
  0xb7   : > { %839 = vmatprep.mubr.bf16.mxu0 %v1586_v9  ;;  %967 = vmatprep.mubr.bf16.mxu1 %v1588_v10 }
  0xbe   : > { %840 = vmatmul.mubr.bf16.gmra.mrb[56].mxu0 %v1590_v11  ;;  %968 = vmatmul.mubr.bf16.gmra.mrb[56].mxu1 %v1591_v12 }
  0xbf   : > { %847 = vmatprep.mubr.bf16.mxu0 %v1592_v13  ;;  %975 = vmatprep.mubr.bf16.mxu1 %v1594_v14 }
  0xc6   : > { %848 = vmatmul.mubr.bf16.gmra.mrb[60].mxu0 %v1596_v15  ;;  %976 = vmatmul.mubr.bf16.gmra.mrb[60].mxu1 %v1597_v16 }
 0x121   : > { %v729_v18 = vpop.f32.mrb[0].mxu0  ;;  %v857_v19 = vpop.f32.mrb[0].mxu1 }
 0x122   : > { %v730_v20 = vadd.f32 %v1888_v17, %v729_v18  ;;  %v858_v21 = vadd.f32 %v1888_v17, %v857_v19  ;;  %v731_v22 = vpop.f32.mrb[1].mxu0  ;;  %v859_v23 = vpop.f32.mrb[1].mxu1 }
 0x123   : > { %v732_v24 = vpop.f32.mrb[2].mxu0  ;;  %v860_v25 = vpop.f32.mrb[2].mxu1 }
 0x124   : > { %vm984_vm0 = vcmp.gt.f32.partialorder %v730_v20, 0.0  ;;  %v1048_v26 = vmul.f32 0.1, %v730_v20  ;;  %vm1016_vm1 = vcmp.gt.f32.partialorder %v858_v21, 0.0  ;;  %v1080_v27 = vmul.f32 0.1, %v858_v21 }
 0x125   : > { %v733_v28 = vadd.f32 %v1888_v17, %v732_v24  ;;  %v861_v29 = vadd.f32 %v1888_v17, %v860_v25  ;;  %v734_v30 = vpop.f32.mrb[3].mxu0  ;;  %v862_v31 = vpop.f32.mrb[3].mxu1 }
 0x126   : > { %v1112_v32 = vsel %vm984_vm0, %v730_v20, %v1048_v26  ;;  %v1144_v33 = vsel %vm1016_vm1, %v858_v21, %v1080_v27 }
 0x127   : > { %1176 = vst [vmem:[%s1896_s11] sm:$0xff] %v1112_v32  ;;  %1208 = vst [vmem:[%s1896_s11 + $0x100] sm:$0xff] %v1144_v33  ;;  %vm985_vm2 = vcmp.gt.f32.partialorder %v733_v28, 0.0  ;;  %v1049_v34 = vmul.f32 0.1, %v733_v28  ;;  %vm1017_vm3 = vcmp.gt.f32.partialorder %v861_v29, 0.0 }
 0x128   : > { %v1081_v35 = vmul.f32 0.1, %v861_v29 }
 0x129   : > { %v1113_v36 = vsel %vm985_vm2, %v733_v28, %v1049_v34  ;;  %v737_v38 = vpop.f32.mrb[4].mxu0  ;;  %v865_v39 = vpop.f32.mrb[4].mxu1 }
 0x12a   : > { %v1145_v37 = vsel %vm1017_vm3, %v861_v29, %v1081_v35  ;;  %1177 = vst [vmem:[%s1896_s11 + $0x8] sm:$0xff] %v1113_v36  ;;  %v738_v40 = vadd.f32 %v1888_v17, %v737_v38  ;;  %v866_v41 = vadd.f32 %v1888_v17, %v865_v39  ;;  %v739_v42 = vpop.f32.mrb[5].mxu0  ;;  %v867_v43 = vpop.f32.mrb[5].mxu1 }
 0x12b   : > { %1209 = vst [vmem:[%s1896_s11 + $0x108] sm:$0xff] %v1145_v37  ;;  %v740_v44 = vpop.f32.mrb[6].mxu0  ;;  %v868_v45 = vpop.f32.mrb[6].mxu1 }
 0x12c   : > { %vm986_vm4 = vcmp.gt.f32.partialorder %v738_v40, 0.0  ;;  %v1050_v46 = vmul.f32 0.1, %v738_v40  ;;  %vm1018_vm5 = vcmp.gt.f32.partialorder %v866_v41, 0.0  ;;  %v1082_v47 = vmul.f32 0.1, %v866_v41 }
 0x12d   : > { %v741_v48 = vadd.f32 %v1888_v17, %v740_v44  ;;  %v869_v49 = vadd.f32 %v1888_v17, %v868_v45  ;;  %v742_v50 = vpop.f32.mrb[7].mxu0  ;;  %v870_v51 = vpop.f32.mrb[7].mxu1 }
 0x12e   : > { %v1114_v52 = vsel %vm986_vm4, %v738_v40, %v1050_v46  ;;  %v1146_v53 = vsel %vm1018_vm5, %v866_v41, %v1082_v47 }
 0x12f   : > { %1178 = vst [vmem:[%s1896_s11 + $0x10] sm:$0xff] %v1114_v52  ;;  %1210 = vst [vmem:[%s1896_s11 + $0x110] sm:$0xff] %v1146_v53  ;;  %vm987_vm6 = vcmp.gt.f32.partialorder %v741_v48, 0.0  ;;  %v1051_v54 = vmul.f32 0.1, %v741_v48  ;;  %vm1019_vm7 = vcmp.gt.f32.partialorder %v869_v49, 0.0 }
 0x130   : > { %v1083_v55 = vmul.f32 0.1, %v869_v49 }
 0x131   : > { %v1115_v56 = vsel %vm987_vm6, %v741_v48, %v1051_v54  ;;  %v745_v58 = vpop.f32.mrb[8].mxu0  ;;  %v873_v59 = vpop.f32.mrb[8].mxu1 }
 0x132   : > { %v1147_v57 = vsel %vm1019_vm7, %v869_v49, %v1083_v55  ;;  %1179 = vst [vmem:[%s1896_s11 + $0x18] sm:$0xff] %v1115_v56  ;;  %v746_v60 = vadd.f32 %v1888_v17, %v745_v58  ;;  %v874_v61 = vadd.f32 %v1888_v17, %v873_v59  ;;  %v747_v62 = vpop.f32.mrb[9].mxu0  ;;  %v875_v63 = vpop.f32.mrb[9].mxu1 }
 0x133   : > { %1211 = vst [vmem:[%s1896_s11 + $0x118] sm:$0xff] %v1147_v57  ;;  %v748_v0 = vpop.f32.mrb[10].mxu0  ;;  %v876_v1 = vpop.f32.mrb[10].mxu1 }
 0x134   : > { %vm988_vm8 = vcmp.gt.f32.partialorder %v746_v60, 0.0  ;;  %v1052_v2 = vmul.f32 0.1, %v746_v60  ;;  %vm1020_vm9 = vcmp.gt.f32.partialorder %v874_v61, 0.0  ;;  %v1084_v3 = vmul.f32 0.1, %v874_v61 }
 0x135   : > { %v749_v4 = vadd.f32 %v1888_v17, %v748_v0  ;;  %v877_v5 = vadd.f32 %v1888_v17, %v876_v1  ;;  %v750_v6 = vpop.f32.mrb[11].mxu0  ;;  %v878_v7 = vpop.f32.mrb[11].mxu1 }
 0x136   : > { %v1116_v8 = vsel %vm988_vm8, %v746_v60, %v1052_v2  ;;  %v1148_v9 = vsel %vm1020_vm9, %v874_v61, %v1084_v3 }
 0x137   : > { %1180 = vst [vmem:[%s1896_s11 + $0x20] sm:$0xff] %v1116_v8  ;;  %1212 = vst [vmem:[%s1896_s11 + $0x120] sm:$0xff] %v1148_v9  ;;  %vm989_vm10 = vcmp.gt.f32.partialorder %v749_v4, 0.0  ;;  %v1053_v10 = vmul.f32 0.1, %v749_v4  ;;  %vm1021_vm11 = vcmp.gt.f32.partialorder %v877_v5, 0.0 }
 0x138   : > { %v1085_v11 = vmul.f32 0.1, %v877_v5 }
 0x139   : > { %v1117_v12 = vsel %vm989_vm10, %v749_v4, %v1053_v10  ;;  %v753_v14 = vpop.f32.mrb[12].mxu0  ;;  %v881_v15 = vpop.f32.mrb[12].mxu1 }
 0x13a   : > { %v1149_v13 = vsel %vm1021_vm11, %v877_v5, %v1085_v11  ;;  %1181 = vst [vmem:[%s1896_s11 + $0x28] sm:$0xff] %v1117_v12  ;;  %v754_v16 = vadd.f32 %v1888_v17, %v753_v14  ;;  %v882_v18 = vadd.f32 %v1888_v17, %v881_v15  ;;  %v755_v19 = vpop.f32.mrb[13].mxu0  ;;  %v883_v20 = vpop.f32.mrb[13].mxu1 }
 0x13b   : > { %1213 = vst [vmem:[%s1896_s11 + $0x128] sm:$0xff] %v1149_v13  ;;  %v756_v21 = vpop.f32.mrb[14].mxu0  ;;  %v884_v22 = vpop.f32.mrb[14].mxu1 }
 0x13c   : > { %vm990_vm12 = vcmp.gt.f32.partialorder %v754_v16, 0.0  ;;  %v1054_v23 = vmul.f32 0.1, %v754_v16  ;;  %vm1022_vm13 = vcmp.gt.f32.partialorder %v882_v18, 0.0  ;;  %v1086_v24 = vmul.f32 0.1, %v882_v18 }
 0x13d   : > { %v757_v25 = vadd.f32 %v1888_v17, %v756_v21  ;;  %v885_v26 = vadd.f32 %v1888_v17, %v884_v22  ;;  %v758_v27 = vpop.f32.mrb[15].mxu0  ;;  %v886_v28 = vpop.f32.mrb[15].mxu1 }
 0x13e   : > { %v1118_v29 = vsel %vm990_vm12, %v754_v16, %v1054_v23  ;;  %v1150_v30 = vsel %vm1022_vm13, %v882_v18, %v1086_v24 }
 0x13f   : > { %1182 = vst [vmem:[%s1896_s11 + $0x30] sm:$0xff] %v1118_v29  ;;  %1214 = vst [vmem:[%s1896_s11 + $0x130] sm:$0xff] %v1150_v30  ;;  %vm991_vm14 = vcmp.gt.f32.partialorder %v757_v25, 0.0  ;;  %v1055_v31 = vmul.f32 0.1, %v757_v25  ;;  %vm1023_vm15 = vcmp.gt.f32.partialorder %v885_v26, 0.0 }
 0x140   : > { %v1087_v32 = vmul.f32 0.1, %v885_v26 }
 0x141   : > { %v1119_v33 = vsel %vm991_vm14, %v757_v25, %v1055_v31  ;;  %v761_v35 = vpop.f32.mrb[16].mxu0  ;;  %v889_v36 = vpop.f32.mrb[16].mxu1 }
 0x142   : > { %v1151_v34 = vsel %vm1023_vm15, %v885_v26, %v1087_v32  ;;  %1183 = vst [vmem:[%s1896_s11 + $0x38] sm:$0xff] %v1119_v33  ;;  %v762_v37 = vadd.f32 %v1888_v17, %v761_v35  ;;  %v890_v38 = vadd.f32 %v1888_v17, %v889_v36  ;;  %v763_v39 = vpop.f32.mrb[17].mxu0  ;;  %v891_v40 = vpop.f32.mrb[17].mxu1 }
 0x143   : > { %1215 = vst [vmem:[%s1896_s11 + $0x138] sm:$0xff] %v1151_v34  ;;  %v764_v41 = vpop.f32.mrb[18].mxu0  ;;  %v892_v42 = vpop.f32.mrb[18].mxu1 }
 0x144   : > { %vm992_vm0 = vcmp.gt.f32.partialorder %v762_v37, 0.0  ;;  %v1056_v43 = vmul.f32 0.1, %v762_v37  ;;  %vm1024_vm1 = vcmp.gt.f32.partialorder %v890_v38, 0.0  ;;  %v1088_v44 = vmul.f32 0.1, %v890_v38 }
 0x145   : > { %v765_v45 = vadd.f32 %v1888_v17, %v764_v41  ;;  %v893_v46 = vadd.f32 %v1888_v17, %v892_v42  ;;  %v766_v47 = vpop.f32.mrb[19].mxu0  ;;  %v894_v48 = vpop.f32.mrb[19].mxu1 }
 0x146   : > { %v1120_v49 = vsel %vm992_vm0, %v762_v37, %v1056_v43  ;;  %v1152_v50 = vsel %vm1024_vm1, %v890_v38, %v1088_v44 }
 0x147   : > { %1184 = vst [vmem:[%s1896_s11 + $0x40] sm:$0xff] %v1120_v49  ;;  %1216 = vst [vmem:[%s1896_s11 + $0x140] sm:$0xff] %v1152_v50  ;;  %vm993_vm2 = vcmp.gt.f32.partialorder %v765_v45, 0.0  ;;  %v1057_v51 = vmul.f32 0.1, %v765_v45  ;;  %vm1025_vm3 = vcmp.gt.f32.partialorder %v893_v46, 0.0 }
 0x148   : > { %v1089_v52 = vmul.f32 0.1, %v893_v46 }
 0x149   : > { %v1121_v53 = vsel %vm993_vm2, %v765_v45, %v1057_v51  ;;  %v769_v55 = vpop.f32.mrb[20].mxu0  ;;  %v897_v56 = vpop.f32.mrb[20].mxu1 }
 0x14a   : > { %v1153_v54 = vsel %vm1025_vm3, %v893_v46, %v1089_v52  ;;  %1185 = vst [vmem:[%s1896_s11 + $0x48] sm:$0xff] %v1121_v53  ;;  %v770_v57 = vadd.f32 %v1888_v17, %v769_v55  ;;  %v898_v58 = vadd.f32 %v1888_v17, %v897_v56  ;;  %v771_v59 = vpop.f32.mrb[21].mxu0  ;;  %v899_v60 = vpop.f32.mrb[21].mxu1 }
 0x14b   : > { %1217 = vst [vmem:[%s1896_s11 + $0x148] sm:$0xff] %v1153_v54  ;;  %v772_v61 = vpop.f32.mrb[22].mxu0  ;;  %v900_v62 = vpop.f32.mrb[22].mxu1 }
 0x14c   : > { %vm994_vm4 = vcmp.gt.f32.partialorder %v770_v57, 0.0  ;;  %v1058_v63 = vmul.f32 0.1, %v770_v57  ;;  %vm1026_vm5 = vcmp.gt.f32.partialorder %v898_v58, 0.0  ;;  %v1090_v0 = vmul.f32 0.1, %v898_v58 }
 0x14d   : > { %v773_v1 = vadd.f32 %v1888_v17, %v772_v61  ;;  %v901_v2 = vadd.f32 %v1888_v17, %v900_v62  ;;  %v774_v3 = vpop.f32.mrb[23].mxu0  ;;  %v902_v4 = vpop.f32.mrb[23].mxu1 }
 0x14e   : > { %v1122_v5 = vsel %vm994_vm4, %v770_v57, %v1058_v63  ;;  %v1154_v6 = vsel %vm1026_vm5, %v898_v58, %v1090_v0 }
 0x14f   : > { %1186 = vst [vmem:[%s1896_s11 + $0x50] sm:$0xff] %v1122_v5  ;;  %1218 = vst [vmem:[%s1896_s11 + $0x150] sm:$0xff] %v1154_v6  ;;  %vm995_vm6 = vcmp.gt.f32.partialorder %v773_v1, 0.0  ;;  %v1059_v7 = vmul.f32 0.1, %v773_v1  ;;  %vm1027_vm7 = vcmp.gt.f32.partialorder %v901_v2, 0.0 }
 0x150   : > { %v1091_v8 = vmul.f32 0.1, %v901_v2 }
 0x151   : > { %v1123_v9 = vsel %vm995_vm6, %v773_v1, %v1059_v7  ;;  %v777_v11 = vpop.f32.mrb[24].mxu0  ;;  %v905_v12 = vpop.f32.mrb[24].mxu1 }
 0x152   : > { %v1155_v10 = vsel %vm1027_vm7, %v901_v2, %v1091_v8  ;;  %1187 = vst [vmem:[%s1896_s11 + $0x58] sm:$0xff] %v1123_v9  ;;  %v778_v13 = vadd.f32 %v1888_v17, %v777_v11  ;;  %v906_v14 = vadd.f32 %v1888_v17, %v905_v12  ;;  %v779_v15 = vpop.f32.mrb[25].mxu0  ;;  %v907_v16 = vpop.f32.mrb[25].mxu1 }
 0x153   : > { %1219 = vst [vmem:[%s1896_s11 + $0x158] sm:$0xff] %v1155_v10  ;;  %v780_v18 = vpop.f32.mrb[26].mxu0  ;;  %v908_v19 = vpop.f32.mrb[26].mxu1 }
 0x154   : > { %vm996_vm8 = vcmp.gt.f32.partialorder %v778_v13, 0.0  ;;  %v1060_v20 = vmul.f32 0.1, %v778_v13  ;;  %vm1028_vm9 = vcmp.gt.f32.partialorder %v906_v14, 0.0  ;;  %v1092_v21 = vmul.f32 0.1, %v906_v14 }
 0x155   : > { %v781_v22 = vadd.f32 %v1888_v17, %v780_v18  ;;  %v909_v23 = vadd.f32 %v1888_v17, %v908_v19  ;;  %v782_v24 = vpop.f32.mrb[27].mxu0  ;;  %v910_v25 = vpop.f32.mrb[27].mxu1 }
 0x156   : > { %v1124_v26 = vsel %vm996_vm8, %v778_v13, %v1060_v20  ;;  %v1156_v27 = vsel %vm1028_vm9, %v906_v14, %v1092_v21 }
 0x157   : > { %1188 = vst [vmem:[%s1896_s11 + $0x60] sm:$0xff] %v1124_v26  ;;  %1220 = vst [vmem:[%s1896_s11 + $0x160] sm:$0xff] %v1156_v27  ;;  %vm997_vm10 = vcmp.gt.f32.partialorder %v781_v22, 0.0  ;;  %v1061_v28 = vmul.f32 0.1, %v781_v22  ;;  %vm1029_vm11 = vcmp.gt.f32.partialorder %v909_v23, 0.0 }
 0x158   : > { %v1093_v29 = vmul.f32 0.1, %v909_v23 }
 0x159   : > { %v1125_v30 = vsel %vm997_vm10, %v781_v22, %v1061_v28  ;;  %v785_v32 = vpop.f32.mrb[28].mxu0  ;;  %v913_v33 = vpop.f32.mrb[28].mxu1 }
 0x15a   : > { %v1157_v31 = vsel %vm1029_vm11, %v909_v23, %v1093_v29  ;;  %1189 = vst [vmem:[%s1896_s11 + $0x68] sm:$0xff] %v1125_v30  ;;  %v786_v34 = vadd.f32 %v1888_v17, %v785_v32  ;;  %v914_v35 = vadd.f32 %v1888_v17, %v913_v33  ;;  %v787_v36 = vpop.f32.mrb[29].mxu0  ;;  %v915_v37 = vpop.f32.mrb[29].mxu1 }
 0x15b   : > { %1221 = vst [vmem:[%s1896_s11 + $0x168] sm:$0xff] %v1157_v31  ;;  %v788_v38 = vpop.f32.mrb[30].mxu0  ;;  %v916_v39 = vpop.f32.mrb[30].mxu1 }
 0x15c   : > { %vm998_vm12 = vcmp.gt.f32.partialorder %v786_v34, 0.0  ;;  %v1062_v40 = vmul.f32 0.1, %v786_v34  ;;  %vm1030_vm13 = vcmp.gt.f32.partialorder %v914_v35, 0.0  ;;  %v1094_v41 = vmul.f32 0.1, %v914_v35 }
 0x15d   : > { %v789_v42 = vadd.f32 %v1888_v17, %v788_v38  ;;  %v917_v43 = vadd.f32 %v1888_v17, %v916_v39  ;;  %v790_v44 = vpop.f32.mrb[31].mxu0  ;;  %v918_v45 = vpop.f32.mrb[31].mxu1 }
 0x15e   : > { %v1126_v46 = vsel %vm998_vm12, %v786_v34, %v1062_v40  ;;  %v1158_v47 = vsel %vm1030_vm13, %v914_v35, %v1094_v41 }
 0x15f   : > { %1190 = vst [vmem:[%s1896_s11 + $0x70] sm:$0xff] %v1126_v46  ;;  %1222 = vst [vmem:[%s1896_s11 + $0x170] sm:$0xff] %v1158_v47  ;;  %vm999_vm14 = vcmp.gt.f32.partialorder %v789_v42, 0.0  ;;  %v1063_v48 = vmul.f32 0.1, %v789_v42  ;;  %vm1031_vm15 = vcmp.gt.f32.partialorder %v917_v43, 0.0 }
 0x160   : > { %v1095_v49 = vmul.f32 0.1, %v917_v43 }
 0x161   : > { %v1127_v50 = vsel %vm999_vm14, %v789_v42, %v1063_v48  ;;  %v793_v52 = vpop.f32.mrb[32].mxu0  ;;  %v921_v53 = vpop.f32.mrb[32].mxu1 }
 0x162   : > { %v1159_v51 = vsel %vm1031_vm15, %v917_v43, %v1095_v49  ;;  %1191 = vst [vmem:[%s1896_s11 + $0x78] sm:$0xff] %v1127_v50  ;;  %v794_v54 = vadd.f32 %v1888_v17, %v793_v52  ;;  %v922_v55 = vadd.f32 %v1888_v17, %v921_v53  ;;  %v795_v56 = vpop.f32.mrb[33].mxu0  ;;  %v923_v57 = vpop.f32.mrb[33].mxu1 }
 0x163   : > { %1223 = vst [vmem:[%s1896_s11 + $0x178] sm:$0xff] %v1159_v51  ;;  %v796_v58 = vpop.f32.mrb[34].mxu0  ;;  %v924_v59 = vpop.f32.mrb[34].mxu1 }
 0x164   : > { %vm1000_vm0 = vcmp.gt.f32.partialorder %v794_v54, 0.0  ;;  %v1064_v60 = vmul.f32 0.1, %v794_v54  ;;  %vm1032_vm1 = vcmp.gt.f32.partialorder %v922_v55, 0.0  ;;  %v1096_v61 = vmul.f32 0.1, %v922_v55 }
 0x165   : > { %v797_v62 = vadd.f32 %v1888_v17, %v796_v58  ;;  %v925_v63 = vadd.f32 %v1888_v17, %v924_v59  ;;  %v798_v0 = vpop.f32.mrb[35].mxu0  ;;  %v926_v1 = vpop.f32.mrb[35].mxu1 }
 0x166   : > { %v1128_v2 = vsel %vm1000_vm0, %v794_v54, %v1064_v60  ;;  %v1160_v3 = vsel %vm1032_vm1, %v922_v55, %v1096_v61 }
 0x167   : > { %1192 = vst [vmem:[%s1896_s11 + $0x80] sm:$0xff] %v1128_v2  ;;  %1224 = vst [vmem:[%s1896_s11 + $0x180] sm:$0xff] %v1160_v3  ;;  %vm1001_vm2 = vcmp.gt.f32.partialorder %v797_v62, 0.0  ;;  %v1065_v4 = vmul.f32 0.1, %v797_v62  ;;  %vm1033_vm3 = vcmp.gt.f32.partialorder %v925_v63, 0.0 }
 0x168   : > { %v1097_v5 = vmul.f32 0.1, %v925_v63 }
 0x169   : > { %v1129_v6 = vsel %vm1001_vm2, %v797_v62, %v1065_v4  ;;  %v801_v8 = vpop.f32.mrb[36].mxu0  ;;  %v929_v9 = vpop.f32.mrb[36].mxu1 }
 0x16a   : > { %v1161_v7 = vsel %vm1033_vm3, %v925_v63, %v1097_v5  ;;  %1193 = vst [vmem:[%s1896_s11 + $0x88] sm:$0xff] %v1129_v6  ;;  %v802_v10 = vadd.f32 %v1888_v17, %v801_v8  ;;  %v930_v11 = vadd.f32 %v1888_v17, %v929_v9  ;;  %v803_v12 = vpop.f32.mrb[37].mxu0  ;;  %v931_v13 = vpop.f32.mrb[37].mxu1 }
 0x16b   : > { %1225 = vst [vmem:[%s1896_s11 + $0x188] sm:$0xff] %v1161_v7  ;;  %v804_v14 = vpop.f32.mrb[38].mxu0  ;;  %v932_v15 = vpop.f32.mrb[38].mxu1 }
 0x16c   : > { %vm1002_vm4 = vcmp.gt.f32.partialorder %v802_v10, 0.0  ;;  %v1066_v16 = vmul.f32 0.1, %v802_v10  ;;  %vm1034_vm5 = vcmp.gt.f32.partialorder %v930_v11, 0.0  ;;  %v1098_v18 = vmul.f32 0.1, %v930_v11 }
 0x16d   : > { %v805_v19 = vadd.f32 %v1888_v17, %v804_v14  ;;  %v933_v20 = vadd.f32 %v1888_v17, %v932_v15  ;;  %v806_v21 = vpop.f32.mrb[39].mxu0  ;;  %v934_v22 = vpop.f32.mrb[39].mxu1 }
 0x16e   : > { %v1130_v23 = vsel %vm1002_vm4, %v802_v10, %v1066_v16  ;;  %v1162_v24 = vsel %vm1034_vm5, %v930_v11, %v1098_v18 }
 0x16f   : > { %1194 = vst [vmem:[%s1896_s11 + $0x90] sm:$0xff] %v1130_v23  ;;  %1226 = vst [vmem:[%s1896_s11 + $0x190] sm:$0xff] %v1162_v24  ;;  %vm1003_vm6 = vcmp.gt.f32.partialorder %v805_v19, 0.0  ;;  %v1067_v25 = vmul.f32 0.1, %v805_v19  ;;  %vm1035_vm7 = vcmp.gt.f32.partialorder %v933_v20, 0.0 }
 0x170   : > { %v1099_v26 = vmul.f32 0.1, %v933_v20 }
 0x171   : > { %v1131_v27 = vsel %vm1003_vm6, %v805_v19, %v1067_v25  ;;  %v809_v29 = vpop.f32.mrb[40].mxu0  ;;  %v937_v30 = vpop.f32.mrb[40].mxu1 }
 0x172   : > { %v1163_v28 = vsel %vm1035_vm7, %v933_v20, %v1099_v26  ;;  %1195 = vst [vmem:[%s1896_s11 + $0x98] sm:$0xff] %v1131_v27  ;;  %v810_v31 = vadd.f32 %v1888_v17, %v809_v29  ;;  %v938_v32 = vadd.f32 %v1888_v17, %v937_v30  ;;  %v811_v33 = vpop.f32.mrb[41].mxu0  ;;  %v939_v34 = vpop.f32.mrb[41].mxu1 }
 0x173   : > { %1227 = vst [vmem:[%s1896_s11 + $0x198] sm:$0xff] %v1163_v28  ;;  %v812_v35 = vpop.f32.mrb[42].mxu0  ;;  %v940_v36 = vpop.f32.mrb[42].mxu1 }
 0x174   : > { %vm1004_vm8 = vcmp.gt.f32.partialorder %v810_v31, 0.0  ;;  %v1068_v37 = vmul.f32 0.1, %v810_v31  ;;  %vm1036_vm9 = vcmp.gt.f32.partialorder %v938_v32, 0.0  ;;  %v1100_v38 = vmul.f32 0.1, %v938_v32 }
 0x175   : > { %v813_v39 = vadd.f32 %v1888_v17, %v812_v35  ;;  %v941_v40 = vadd.f32 %v1888_v17, %v940_v36  ;;  %v814_v41 = vpop.f32.mrb[43].mxu0  ;;  %v942_v42 = vpop.f32.mrb[43].mxu1 }
 0x176   : > { %v1132_v43 = vsel %vm1004_vm8, %v810_v31, %v1068_v37  ;;  %v1164_v44 = vsel %vm1036_vm9, %v938_v32, %v1100_v38 }
 0x177   : > { %1196 = vst [vmem:[%s1896_s11 + $0xa0] sm:$0xff] %v1132_v43  ;;  %1228 = vst [vmem:[%s1896_s11 + $0x1a0] sm:$0xff] %v1164_v44  ;;  %vm1005_vm10 = vcmp.gt.f32.partialorder %v813_v39, 0.0  ;;  %v1069_v45 = vmul.f32 0.1, %v813_v39  ;;  %vm1037_vm11 = vcmp.gt.f32.partialorder %v941_v40, 0.0 }
 0x178   : > { %v1101_v46 = vmul.f32 0.1, %v941_v40 }
 0x179   : > { %v1133_v47 = vsel %vm1005_vm10, %v813_v39, %v1069_v45  ;;  %v817_v49 = vpop.f32.mrb[44].mxu0  ;;  %v945_v50 = vpop.f32.mrb[44].mxu1 }
 0x17a   : > { %v1165_v48 = vsel %vm1037_vm11, %v941_v40, %v1101_v46  ;;  %1197 = vst [vmem:[%s1896_s11 + $0xa8] sm:$0xff] %v1133_v47  ;;  %v818_v51 = vadd.f32 %v1888_v17, %v817_v49  ;;  %v946_v52 = vadd.f32 %v1888_v17, %v945_v50  ;;  %v819_v53 = vpop.f32.mrb[45].mxu0  ;;  %v947_v54 = vpop.f32.mrb[45].mxu1 }
 0x17b   : > { %1229 = vst [vmem:[%s1896_s11 + $0x1a8] sm:$0xff] %v1165_v48  ;;  %v820_v55 = vpop.f32.mrb[46].mxu0  ;;  %v948_v56 = vpop.f32.mrb[46].mxu1 }
 0x17c   : > { %vm1006_vm12 = vcmp.gt.f32.partialorder %v818_v51, 0.0  ;;  %v1070_v57 = vmul.f32 0.1, %v818_v51  ;;  %vm1038_vm13 = vcmp.gt.f32.partialorder %v946_v52, 0.0  ;;  %v1102_v58 = vmul.f32 0.1, %v946_v52 }
 0x17d   : > { %v821_v59 = vadd.f32 %v1888_v17, %v820_v55  ;;  %v949_v60 = vadd.f32 %v1888_v17, %v948_v56  ;;  %v822_v61 = vpop.f32.mrb[47].mxu0  ;;  %v950_v62 = vpop.f32.mrb[47].mxu1 }
 0x17e   : > { %v1134_v63 = vsel %vm1006_vm12, %v818_v51, %v1070_v57  ;;  %v1166_v0 = vsel %vm1038_vm13, %v946_v52, %v1102_v58 }
 0x17f   : > { %1198 = vst [vmem:[%s1896_s11 + $0xb0] sm:$0xff] %v1134_v63  ;;  %1230 = vst [vmem:[%s1896_s11 + $0x1b0] sm:$0xff] %v1166_v0  ;;  %vm1007_vm14 = vcmp.gt.f32.partialorder %v821_v59, 0.0  ;;  %v1071_v1 = vmul.f32 0.1, %v821_v59  ;;  %vm1039_vm15 = vcmp.gt.f32.partialorder %v949_v60, 0.0 }
 0x180   : > { %v1103_v2 = vmul.f32 0.1, %v949_v60 }
 0x181   : > { %v1135_v3 = vsel %vm1007_vm14, %v821_v59, %v1071_v1  ;;  %v825_v5 = vpop.f32.mrb[48].mxu0  ;;  %v953_v6 = vpop.f32.mrb[48].mxu1 }
 0x182   : > { %v1167_v4 = vsel %vm1039_vm15, %v949_v60, %v1103_v2  ;;  %1199 = vst [vmem:[%s1896_s11 + $0xb8] sm:$0xff] %v1135_v3  ;;  %v826_v7 = vadd.f32 %v1888_v17, %v825_v5  ;;  %v954_v8 = vadd.f32 %v1888_v17, %v953_v6  ;;  %v827_v9 = vpop.f32.mrb[49].mxu0  ;;  %v955_v10 = vpop.f32.mrb[49].mxu1 }
 0x183   : > { %1231 = vst [vmem:[%s1896_s11 + $0x1b8] sm:$0xff] %v1167_v4  ;;  %v828_v11 = vpop.f32.mrb[50].mxu0  ;;  %v956_v12 = vpop.f32.mrb[50].mxu1 }
 0x184   : > { %vm1008_vm0 = vcmp.gt.f32.partialorder %v826_v7, 0.0  ;;  %v1072_v13 = vmul.f32 0.1, %v826_v7  ;;  %vm1040_vm1 = vcmp.gt.f32.partialorder %v954_v8, 0.0  ;;  %v1104_v14 = vmul.f32 0.1, %v954_v8 }
 0x185   : > { %v829_v15 = vadd.f32 %v1888_v17, %v828_v11  ;;  %v957_v16 = vadd.f32 %v1888_v17, %v956_v12  ;;  %v830_v18 = vpop.f32.mrb[51].mxu0  ;;  %v958_v19 = vpop.f32.mrb[51].mxu1 }
 0x186   : > { %v1136_v20 = vsel %vm1008_vm0, %v826_v7, %v1072_v13  ;;  %v1168_v21 = vsel %vm1040_vm1, %v954_v8, %v1104_v14 }
 0x187   : > { %1200 = vst [vmem:[%s1896_s11 + $0xc0] sm:$0xff] %v1136_v20  ;;  %1232 = vst [vmem:[%s1896_s11 + $0x1c0] sm:$0xff] %v1168_v21  ;;  %vm1009_vm2 = vcmp.gt.f32.partialorder %v829_v15, 0.0  ;;  %v1073_v22 = vmul.f32 0.1, %v829_v15  ;;  %vm1041_vm3 = vcmp.gt.f32.partialorder %v957_v16, 0.0 }
 0x188   : > { %v1105_v23 = vmul.f32 0.1, %v957_v16 }
 0x189   : > { %v1137_v24 = vsel %vm1009_vm2, %v829_v15, %v1073_v22  ;;  %v833_v26 = vpop.f32.mrb[52].mxu0  ;;  %v961_v27 = vpop.f32.mrb[52].mxu1 }
 0x18a   : > { %v1169_v25 = vsel %vm1041_vm3, %v957_v16, %v1105_v23  ;;  %1201 = vst [vmem:[%s1896_s11 + $0xc8] sm:$0xff] %v1137_v24  ;;  %v834_v28 = vadd.f32 %v1888_v17, %v833_v26  ;;  %v962_v29 = vadd.f32 %v1888_v17, %v961_v27  ;;  %v835_v30 = vpop.f32.mrb[53].mxu0  ;;  %v963_v31 = vpop.f32.mrb[53].mxu1 }
 0x18b   : > { %1233 = vst [vmem:[%s1896_s11 + $0x1c8] sm:$0xff] %v1169_v25  ;;  %v836_v32 = vpop.f32.mrb[54].mxu0  ;;  %v964_v33 = vpop.f32.mrb[54].mxu1 }
 0x18c   : > { %vm1010_vm4 = vcmp.gt.f32.partialorder %v834_v28, 0.0  ;;  %v1074_v34 = vmul.f32 0.1, %v834_v28  ;;  %vm1042_vm5 = vcmp.gt.f32.partialorder %v962_v29, 0.0  ;;  %v1106_v35 = vmul.f32 0.1, %v962_v29 }
 0x18d   : > { %v837_v36 = vadd.f32 %v1888_v17, %v836_v32  ;;  %v965_v37 = vadd.f32 %v1888_v17, %v964_v33  ;;  %v838_v38 = vpop.f32.mrb[55].mxu0  ;;  %v966_v39 = vpop.f32.mrb[55].mxu1 }
 0x18e   : > { %v1138_v40 = vsel %vm1010_vm4, %v834_v28, %v1074_v34  ;;  %v1170_v41 = vsel %vm1042_vm5, %v962_v29, %v1106_v35 }
 0x18f   : > { %1202 = vst [vmem:[%s1896_s11 + $0xd0] sm:$0xff] %v1138_v40  ;;  %1234 = vst [vmem:[%s1896_s11 + $0x1d0] sm:$0xff] %v1170_v41  ;;  %vm1011_vm6 = vcmp.gt.f32.partialorder %v837_v36, 0.0  ;;  %v1075_v42 = vmul.f32 0.1, %v837_v36  ;;  %vm1043_vm7 = vcmp.gt.f32.partialorder %v965_v37, 0.0 }
 0x190   : > { %v1107_v43 = vmul.f32 0.1, %v965_v37 }
 0x191   : > { %v1139_v44 = vsel %vm1011_vm6, %v837_v36, %v1075_v42  ;;  %v841_v46 = vpop.f32.mrb[56].mxu0  ;;  %v969_v47 = vpop.f32.mrb[56].mxu1 }
 0x192   : > { %v1171_v45 = vsel %vm1043_vm7, %v965_v37, %v1107_v43  ;;  %1203 = vst [vmem:[%s1896_s11 + $0xd8] sm:$0xff] %v1139_v44  ;;  %v842_v48 = vadd.f32 %v1888_v17, %v841_v46  ;;  %v970_v49 = vadd.f32 %v1888_v17, %v969_v47  ;;  %v843_v50 = vpop.f32.mrb[57].mxu0  ;;  %v971_v51 = vpop.f32.mrb[57].mxu1 }
 0x193   : > { %1235 = vst [vmem:[%s1896_s11 + $0x1d8] sm:$0xff] %v1171_v45  ;;  %v844_v52 = vpop.f32.mrb[58].mxu0  ;;  %v972_v53 = vpop.f32.mrb[58].mxu1 }
 0x194   : > { %vm1012_vm8 = vcmp.gt.f32.partialorder %v842_v48, 0.0  ;;  %v1076_v54 = vmul.f32 0.1, %v842_v48  ;;  %vm1044_vm9 = vcmp.gt.f32.partialorder %v970_v49, 0.0  ;;  %v1108_v55 = vmul.f32 0.1, %v970_v49 }
 0x195   : > { %v845_v56 = vadd.f32 %v1888_v17, %v844_v52  ;;  %v973_v57 = vadd.f32 %v1888_v17, %v972_v53  ;;  %v846_v58 = vpop.f32.mrb[59].mxu0  ;;  %v974_v59 = vpop.f32.mrb[59].mxu1 }
 0x196   : > { %v1140_v60 = vsel %vm1012_vm8, %v842_v48, %v1076_v54  ;;  %v1172_v61 = vsel %vm1044_vm9, %v970_v49, %v1108_v55 }
 0x197   : > { %1204 = vst [vmem:[%s1896_s11 + $0xe0] sm:$0xff] %v1140_v60  ;;  %1236 = vst [vmem:[%s1896_s11 + $0x1e0] sm:$0xff] %v1172_v61  ;;  %vm1013_vm10 = vcmp.gt.f32.partialorder %v845_v56, 0.0  ;;  %v1077_v62 = vmul.f32 0.1, %v845_v56  ;;  %vm1045_vm11 = vcmp.gt.f32.partialorder %v973_v57, 0.0 }
 0x198   : > { %v1109_v63 = vmul.f32 0.1, %v973_v57 }
 0x199   : > { %v1141_v0 = vsel %vm1013_vm10, %v845_v56, %v1077_v62  ;;  %v849_v2 = vpop.f32.mrb[60].mxu0  ;;  %v977_v3 = vpop.f32.mrb[60].mxu1 }
 0x19a   : > { %v1173_v1 = vsel %vm1045_vm11, %v973_v57, %v1109_v63  ;;  %1205 = vst [vmem:[%s1896_s11 + $0xe8] sm:$0xff] %v1141_v0  ;;  %v850_v4 = vadd.f32 %v1888_v17, %v849_v2  ;;  %v978_v5 = vadd.f32 %v1888_v17, %v977_v3  ;;  %v851_v6 = vpop.f32.mrb[61].mxu0  ;;  %v979_v7 = vpop.f32.mrb[61].mxu1 }
 0x19b   : > { %1237 = vst [vmem:[%s1896_s11 + $0x1e8] sm:$0xff] %v1173_v1  ;;  %v852_v8 = vpop.f32.mrb[62].mxu0  ;;  %v980_v9 = vpop.f32.mrb[62].mxu1 }
 0x19c   : > { %vm1014_vm12 = vcmp.gt.f32.partialorder %v850_v4, 0.0  ;;  %v1078_v10 = vmul.f32 0.1, %v850_v4  ;;  %vm1046_vm13 = vcmp.gt.f32.partialorder %v978_v5, 0.0  ;;  %v1110_v11 = vmul.f32 0.1, %v978_v5 }
 0x19d   : > { %v853_v12 = vadd.f32 %v1888_v17, %v852_v8  ;;  %v981_v13 = vadd.f32 %v1888_v17, %v980_v9  ;;  %v854_v14 = vpop.f32.mrb[63].mxu0  ;;  %v982_v15 = vpop.f32.mrb[63].mxu1 }
 0x19e   : > { %v1142_v16 = vsel %vm1014_vm12, %v850_v4, %v1078_v10  ;;  %v1174_v18 = vsel %vm1046_vm13, %v978_v5, %v1110_v11 }
 0x19f   : > { %1206 = vst [vmem:[%s1896_s11 + $0xf0] sm:$0xff] %v1142_v16  ;;  %1238 = vst [vmem:[%s1896_s11 + $0x1f0] sm:$0xff] %v1174_v18  ;;  %vm1015_vm14 = vcmp.gt.f32.partialorder %v853_v12, 0.0  ;;  %v1079_v19 = vmul.f32 0.1, %v853_v12  ;;  %vm1047_vm15 = vcmp.gt.f32.partialorder %v981_v13, 0.0 }
 0x1a0   : > { %v1111_v20 = vmul.f32 0.1, %v981_v13 }
 0x1a1   : > { %v1143_v17 = vsel %vm1015_vm14, %v853_v12, %v1079_v19 }
 0x1a2   : > { %v1175_v21 = vsel %vm1047_vm15, %v981_v13, %v1111_v20  ;;  %1207 = vst [vmem:[%s1896_s11 + $0xf8] sm:$0xff] %v1143_v17 }
 0x1a3   : > { %1239 = vst [vmem:[%s1896_s11 + $0x1f8] sm:$0xff] %v1175_v21 }
 0x1a4   : > { %1611 = shalt.err (!%p1608_p3)
}
 0x1a5   : > { %s1612_s19 = scalar_lea.hbm %s2025_s6, 8192  ;;  %s1616_s25 = scalar_lea.hbm %s2077_s3, 16384 }
 0x1a6   : > { %p1613_p4 = scmp.ne.s32.totalorder %s2025_s6, %s1612_s19  ;;  %p1617_p9 = scmp.lt.u32.totalorder %s2025_s6, %s2077_s3 }
 0x1a7   : > { %p1618_p10 = scmp.lt.u32.totalorder %s1616_s25, %s1612_s19  ;;  %p1620_p12 = scmp.lt.u32.totalorder %s1612_s19, %s2025_s6 }
 0x1a8   : > { %p1614_p7 = pnand %p1613_p4, %p1724_p5 }
 0x1a9   : > { %p1619_p11 = por %p1618_p10, %p1617_p9 }
 0x1aa   : > { %p1615_p8 = pneg %p1614_p7 }
 0x1ab   : > { %p1621_p13 = por %p1620_p12, %p1619_p11 }
 0x1ad   : > { %p1622_p0 = pnand %p1621_p13, %p1615_p8 }
 0x1af   : > { %1625 = shalt.err (!%p1622_p0)
}
 0x1b0   : > { %s1664_s28 = smov 128   ;;  %s1665_s29 = smov 8  }
 0x1b1   : > { %1444 = dma.vmem_to_hbm [thread:$0]  (%p1724_p5), %s2027_s4, 8192, %s2025_s6, %s2033_s7, %s1664_s28, %s1664_s28, %s1665_s29  }
 0x1b2 PF: > { %p1450_p1 = scmp.ge.s32.totalorder %s1660_s15, 2  ;;  %s1269_s11 = sand.u32 1, %s1648_s12  }
 0x1b3   : > { %s1270_s30 = scalar_lea.sflag [#allocation3], %s1269_s11 }
 0x1b4   : > { %p1447_p2 = pnand %p1450_p1, %p1728_p6 }
 0x1b6   : > { %1643 = dma.done.wait (!%p1447_p2), %s1270_s30, 8192  }
 0x1b7   : > { %1645 = vsyncadd (!%p1447_p2), %s1270_s30, 4294959104  ;;  %p13_p3 = scmp.ge.s32.totalorder %s1711_s18, 4   ;;  %s2080_s12 = smov %s1652_s13 }
 0x1b8   : > { %s2081_s13 = smov %s1656_s14  ;;  %s2082_s14 = smov %s1722_s21 }
 0x1b9   : > { %s2083_s15 = smov %s1711_s18  ;;  %15 = sbr.rel (!%p13_p3) target bundleno = 3 (0x3), region = 67 }
 0x1c0   :  { %1275 = vsyncpa [#allocation3], 1 }
 0x1c1   :  { %1277 = vsyncpa [#allocation3 + $0x1], 1 }

</bundles_post_ra>
